<compile_context>
chip_gen: v7x
topology: tpu7x:2x2x1
jax: 0.10.0
libtpu: 0.0.40
codegen_flags: <defaults>
</compile_context>

<pallas_src>
import functools

import jax
import jax.numpy as jnp
import numpy as np
from jax.experimental import pallas as pl
from jax.experimental.pallas import tpu as pltpu


def _round_up(x, m):
    return ((x + m - 1) // m) * m


def _fused_net_kernel(x_ref, a_ref, w_ref, b_ref, att_ref, o_ref, *, f_pad):
    """One grid step == one GeneralConv layer; o_ref carries the activations."""
    l = pl.program_id(0)
    n_layers = pl.num_programs(0)

    # Seed the resident activation slab with the (padded) node features.
    @pl.when(l == 0)
    def _():
        o_ref[...] = x_ref[...]

    h = o_ref[...]                                     # (Np, Fp) activations
    a = a_ref[...]                                     # (Np, Np) dense adjacency, dst x src
    mask = a > 0.0                                     # in-edge mask

    w = w_ref[0]                                       # (Fp, 2*Fp) = [W_msg | W_self]
    b = b_ref[0]                                       # (1, 2*Fp)  = [b_msg | b_self]
    att = att_ref[0]                                   # (1, Fp)

    # --- MXU pass 1: message projection + self connection in one matmul -----
    xw = jnp.dot(h, w, preferred_element_type=jnp.float32) + b   # (Np, 2*Fp)
    m = xw[:, :f_pad]                                  # messages (per source node)
    self_term = xw[:, f_pad:]                          # Linear self, or packed Identity

    # Additive attention logit; depends only on the source node for heads=1.
    alpha = jnp.sum(m * att, axis=-1, keepdims=True)   # (Np, 1)
    alpha = jnp.where(alpha >= 0.0, alpha, 0.2 * alpha)  # leaky_relu(0.2)

    # Per-destination softmax max over in-neighbours (matches PyG numerics and
    # avoids group-wide exp underflow).  (Np,1)->(Np,Np) lane-broadcast followed
    # by a 128-aligned square transpose keeps us on well-supported layouts.
    alpha_src = jnp.broadcast_to(alpha, a.shape).T     # alpha_src[i, j] = alpha_j
    neg_big = jnp.float32(-1e30)
    row_max = jnp.max(jnp.where(mask, alpha_src, neg_big), axis=-1, keepdims=True)
    expo = jnp.where(mask, alpha_src - row_max, neg_big)   # <= 0 on edges, "-inf" elsewhere
    a_e = a * jnp.exp(expo)                            # edge-count-weighted exp(alpha)

    # --- MXU pass 2: fused numerator/denominator -----------------------------
    # Put a ones-column at the spare lane DEN so a single A_e @ [m | 1] matmul
    # yields both sum_j A_e*m_j (columns < DEN) and sum_j A_e (column DEN).
    den_col = f_pad - 1
    col = jax.lax.broadcasted_iota(jnp.int32, m.shape, 1)          # (Np, Fp)
    m_aug = jnp.where(col == den_col, 1.0, m)
    res = jnp.dot(a_e, m_aug, preferred_element_type=jnp.float32)  # (Np, Fp)

    den = jnp.sum(jnp.where(col == den_col, res, 0.0), axis=-1, keepdims=True)  # (Np, 1)
    inv = pl.reciprocal(jnp.where(den > 0.0, den, 1.0), approx=True)            # EUP, no 0-div
    agg = jnp.where((den > 0.0) & (col != den_col), res * inv, 0.0)

    out = agg + self_term
    out = jnp.where(l == n_layers - 1, out, jnp.maximum(out, 0.0))  # ReLU on all but last
    o_ref[...] = out


def init_general_conv(key, d_in, d_out):
    """Deterministic (glorot-style) init of one GeneralConv layer's parameters."""
    k1, k2, k3 = jax.random.split(key, 3)

    def glorot(k, shape):
        fan = shape[0] + shape[1]
        return jax.random.normal(k, shape, jnp.float32) * jnp.sqrt(2.0 / fan)

    return {
        "w_msg": glorot(k1, (d_in, d_out)),           # lin_msg.weight (heads=1)
        "b_msg": jnp.zeros((d_out,), jnp.float32),    # lin_msg.bias
        "att": glorot(k2, (1, d_out)),                # att_msg
        "w_self": glorot(k3, (d_in, d_out)),          # lin_self (used iff in != out)
        "b_self": jnp.zeros((d_out,), jnp.float32),
    }


def multilayer_general_conv_net(x, edge_index, layer_params):
    n, d_in0 = x.shape
    num_layers = len(layer_params)
    dims = [(p["w_msg"].shape[0], p["w_msg"].shape[1]) for p in layer_params]
    d_out_last = dims[-1][1]

    # Lane-dense padding: one spare lane reserved for the fused denominator column.
    f_max = max([d_in0] + [d for pair in dims for d in pair])
    f_pad = _round_up(f_max + 1, 128)
    n_pad = _round_up(n, 128)

    # Dense adjacency A[dst, src] = multiplicity of edge src->dst (PyG edge_index layout).
    a = jnp.zeros((n_pad, n_pad), jnp.float32).at[edge_index[1], edge_index[0]].add(1.0)
    x_pad = jnp.zeros((n_pad, f_pad), jnp.float32).at[:n, :d_in0].set(x.astype(jnp.float32))

    # Pack per-layer params into stacked, zero-padded slabs:
    #   w_all[l] = [W_msg | W_self-or-Identity], b_all[l] = [b_msg | b_self], att_all[l] = att.
    w_all = np.zeros((num_layers, f_pad, 2 * f_pad), np.float32)
    b_all = np.zeros((num_layers, 1, 2 * f_pad), np.float32)
    att_all = np.zeros((num_layers, 1, f_pad), np.float32)
    for l, (p, (di, do)) in enumerate(zip(layer_params, dims)):
        w_all[l, :di, :do] = np.asarray(p["w_msg"])
        b_all[l, 0, :do] = np.asarray(p["b_msg"]).reshape(-1)
        att_all[l, 0, :do] = np.asarray(p["att"]).reshape(-1)
        if di != do:  # lin_self is a Linear
            w_all[l, :di, f_pad:f_pad + do] = np.asarray(p["w_self"])
            b_all[l, 0, f_pad:f_pad + do] = np.asarray(p["b_self"]).reshape(-1)
        else:         # lin_self is Identity -> packed as an exact identity matmul
            w_all[l, :di, f_pad:f_pad + do] = np.eye(di, dtype=np.float32)
    w_all = jnp.asarray(w_all)
    b_all = jnp.asarray(b_all)
    att_all = jnp.asarray(att_all)

    kernel = functools.partial(_fused_net_kernel, f_pad=f_pad)
    out_pad = pl.pallas_call(
        kernel,
        grid=(num_layers,),
        in_specs=[
            pl.BlockSpec((n_pad, f_pad), lambda l: (0, 0)),            # x: fetched once, resident
            pl.BlockSpec((n_pad, n_pad), lambda l: (0, 0)),            # A: fetched once, resident
            pl.BlockSpec((1, f_pad, 2 * f_pad), lambda l: (l, 0, 0)),  # per-layer packed weights (pipelined)
            pl.BlockSpec((1, 1, 2 * f_pad), lambda l: (l, 0, 0)),      # per-layer packed biases
            pl.BlockSpec((1, 1, f_pad), lambda l: (l, 0, 0)),          # per-layer attention vectors
        ],
        out_specs=pl.BlockSpec((n_pad, f_pad), lambda l: (0, 0)),      # lane-dense activation slab (carried)
        out_shape=jax.ShapeDtypeStruct((n_pad, f_pad), jnp.float32),
        compiler_params=pltpu.CompilerParams(
            dimension_semantics=("arbitrary",),          # layers are sequentially dependent
            vmem_limit_bytes=64 * 1024 * 1024,           # explicit scoped-VMEM budget (fits all gens)
        ),
    )(x_pad, a, w_all, b_all, att_all)

    return out_pad[:n, :d_out_last]


def _reference_net(x, edge_index, layer_params):
    """Pure-JAX reference (dense-graph GeneralConv forward, PyG semantics)."""
    n = x.shape[0]
    a = jnp.zeros((n, n), jnp.float32).at[edge_index[1], edge_index[0]].add(1.0)
    num_layers = len(layer_params)
    h = x
    for i, p in enumerate(layer_params):
        d_in, d_out = p["w_msg"].shape
        m = h @ p["w_msg"] + p["b_msg"][None, :]
        alpha = jnp.sum(m * p["att"], axis=-1)
        alpha = jnp.where(alpha >= 0, alpha, 0.2 * alpha)
        e = jnp.exp(alpha - jnp.max(alpha))              # ratio-invariant shift
        num = a @ (e[:, None] * m)
        den = a @ e[:, None]
        agg = jnp.where(den > 0, num / jnp.where(den > 0, den, 1.0), 0.0)
        self_term = (h @ p["w_self"] + p["b_self"][None, :]) if d_in != d_out else h
        out = agg + self_term
        if i != num_layers - 1:
            out = jnp.maximum(out, 0.0)
        h = out
    return h


if __name__ == "__main__":
    key = jax.random.PRNGKey(0)
    N, D_in, H, L, E = 16, 8, 32, 3, 40

    kx, ke, kp = jax.random.split(key, 3)
    x = jax.random.normal(kx, (N, D_in), jnp.float32)
    edge_index = jax.random.randint(ke, (2, E), 0, N, dtype=jnp.int32)

    dims = [(D_in, H)] + [(H, H)] * (L - 2) + [(H, 1)]
    keys = jax.random.split(kp, L)
    layer_params = [init_general_conv(k, di, do) for k, (di, do) in zip(keys, dims)]

    out = multilayer_general_conv_net(x, edge_index, layer_params)
    out = jax.block_until_ready(out)
    assert out.shape == (N, 1) and out.dtype == jnp.float32

    ref = _reference_net(x, edge_index, layer_params)
    np.testing.assert_allclose(np.asarray(out), np.asarray(ref), rtol=1e-2, atol=1e-2)
    print("KERNEL_OK")
</pallas_src>

<mosaic_0001>
module attributes {stable_mosaic.version = 11 : i64} {
  func.func @_fused_net_kernel(%arg0: i32, %arg1: memref<128x128xf32, #tpu.memory_space<vmem>>, %arg2: memref<128x128xf32, #tpu.memory_space<vmem>>, %arg3: memref<1x128x256xf32, #tpu.memory_space<vmem>>, %arg4: memref<1x1x256xf32, #tpu.memory_space<vmem>>, %arg5: memref<1x1x128xf32, #tpu.memory_space<vmem>>, %arg6: memref<128x128xf32, #tpu.memory_space<vmem>>) attributes {dimension_semantics = [#tpu.dimension_semantics<arbitrary>], iteration_bounds = array<i64: 3>, scalar_prefetch = 0 : i64, scratch_operands = 0 : i64, tpu.core_type = #tpu.core_type<tc>, window_params = [{pipeline_mode = #tpu.pipeline_mode<synchronous>, transform_indices = @transform_0, window_bounds = array<i64: 128, 128>}, {pipeline_mode = #tpu.pipeline_mode<synchronous>, transform_indices = @transform_1, window_bounds = array<i64: 128, 128>}, {transform_indices = @transform_2, window_bounds = array<i64: 1, 128, 256>}, {transform_indices = @transform_3, window_bounds = array<i64: 1, 1, 256>}, {transform_indices = @transform_4, window_bounds = array<i64: 1, 1, 128>}, {pipeline_mode = #tpu.pipeline_mode<synchronous>, transform_indices = @transform_5, window_bounds = array<i64: 128, 128>}]} {
    %c0_i32 = arith.constant 0 : i32
    %0 = arith.cmpi eq, %arg0, %c0_i32 : i32
    %1 = arith.extui %0 : i1 to i32
    %c0_i32_0 = arith.constant 0 : i32
    %2 = arith.cmpi ne, %1, %c0_i32_0 : i32
    scf.if %2 {
      %c0_33 = arith.constant 0 : index
      %c0_34 = arith.constant 0 : index
      %73 = vector.load %arg1[%c0_33, %c0_34] : memref<128x128xf32, #tpu.memory_space<vmem>>, vector<128x128xf32>
      %c0_35 = arith.constant 0 : index
      %c0_36 = arith.constant 0 : index
      %74 = vector.load %arg6[%c0_35, %c0_36] : memref<128x128xf32, #tpu.memory_space<vmem>>, vector<128x128xf32>
      tpu.vector_store %arg6[%c0_35, %c0_36], %73 {strides = array<i32>} : memref<128x128xf32, #tpu.memory_space<vmem>>, vector<128x128xf32>,
    } else {
    }
    %c0 = arith.constant 0 : index
    %c0_1 = arith.constant 0 : index
    %3 = vector.load %arg6[%c0, %c0_1] : memref<128x128xf32, #tpu.memory_space<vmem>>, vector<128x128xf32>
    %c0_2 = arith.constant 0 : index
    %c0_3 = arith.constant 0 : index
    %4 = vector.load %arg2[%c0_2, %c0_3] : memref<128x128xf32, #tpu.memory_space<vmem>>, vector<128x128xf32>
    %cst = arith.constant 0.000000e+00 : f32
    %5 = vector.broadcast %cst : f32 to vector<128x128xf32>
    %6 = arith.cmpf ogt, %4, %5 : vector<128x128xf32>
    %c0_4 = arith.constant 0 : index
    %c0_5 = arith.constant 0 : index
    %c0_6 = arith.constant 0 : index
    %7 = vector.load %arg3[%c0_4, %c0_5, %c0_6] : memref<1x128x256xf32, #tpu.memory_space<vmem>>, vector<1x128x256xf32>
    %8 = vector.shape_cast %7 : vector<1x128x256xf32> to vector<128x256xf32>
    %c0_7 = arith.constant 0 : index
    %c0_8 = arith.constant 0 : index
    %c0_9 = arith.constant 0 : index
    %9 = vector.load %arg4[%c0_7, %c0_8, %c0_9] : memref<1x1x256xf32, #tpu.memory_space<vmem>>, vector<1x1x256xf32>
    %10 = vector.shape_cast %9 : vector<1x1x256xf32> to vector<1x256xf32>
    %c0_10 = arith.constant 0 : index
    %c0_11 = arith.constant 0 : index
    %c0_12 = arith.constant 0 : index
    %11 = vector.load %arg5[%c0_10, %c0_11, %c0_12] : memref<1x1x128xf32, #tpu.memory_space<vmem>>, vector<1x1x128xf32>
    %12 = vector.shape_cast %11 : vector<1x1x128xf32> to vector<1x128xf32>
    %cst_13 = arith.constant dense<0.000000e+00> : vector<128x256xf32>
    %13 = tpu.matmul %3, %8, %cst_13 {dimension_numbers = #tpu.dot_dimension_numbers<[1], [0], [0], [1], [0, 0, 1, 1], [], []>} : vector<128x128xf32>, vector<128x256xf32>, vector<128x256xf32> -> vector<128x256xf32>
    %14 = vector.broadcast %10 : vector<1x256xf32> to vector<128x256xf32>
    %15 = arith.addf %13, %14 : vector<128x256xf32>
    %16 = vector.extract_strided_slice %15 {offsets = [0, 0], sizes = [128, 128], strides = [1, 1]} : vector<128x256xf32> to vector<128x128xf32>
    %17 = vector.extract_strided_slice %15 {offsets = [0, 128], sizes = [128, 128], strides = [1, 1]} : vector<128x256xf32> to vector<128x128xf32>
    %18 = vector.broadcast %12 : vector<1x128xf32> to vector<128x128xf32>
    %19 = arith.mulf %16, %18 : vector<128x128xf32>
    %cst_14 = arith.constant dense<0.000000e+00> : vector<128xf32>
    %20 = vector.multi_reduction <add>, %19, %cst_14 [1] : vector<128x128xf32> to vector<128xf32>
    %21 = vector.shape_cast %20 : vector<128xf32> to vector<128x1xf32>
    %cst_15 = arith.constant 0.000000e+00 : f32
    %22 = vector.broadcast %cst_15 : f32 to vector<128x1xf32>
    %23 = arith.cmpf oge, %21, %22 : vector<128x1xf32>
    %cst_16 = arith.constant 2.000000e-01 : f32
    %24 = vector.broadcast %cst_16 : f32 to vector<128x1xf32>
    %25 = arith.mulf %24, %21 : vector<128x1xf32>
    %26 = arith.select %23, %21, %25 : vector<128x1xi1>, vector<128x1xf32>
    %27 = vector.shape_cast %26 : vector<128x1xf32> to vector<128x1xf32>
    %28 = vector.broadcast %27 : vector<128x1xf32> to vector<128x128xf32>
    %29 = tpu.transpose %28, [1, 0] : vector<128x128xf32> -> vector<128x128xf32>
    %cst_17 = arith.constant -1.000000e+30 : f32
    %30 = vector.broadcast %cst_17 : f32 to vector<128x128xf32>
    %31 = arith.select %6, %29, %30 : vector<128x128xi1>, vector<128x128xf32>
    %cst_18 = arith.constant dense<0xFF800000> : vector<128xf32>
    %32 = vector.multi_reduction <maximumf>, %31, %cst_18 [1] : vector<128x128xf32> to vector<128xf32>
    %33 = vector.shape_cast %32 : vector<128xf32> to vector<128x1xf32>
    %34 = vector.broadcast %33 : vector<128x1xf32> to vector<128x128xf32>
    %35 = arith.subf %29, %34 : vector<128x128xf32>
    %cst_19 = arith.constant -1.000000e+30 : f32
    %36 = vector.broadcast %cst_19 : f32 to vector<128x128xf32>
    %37 = arith.select %6, %35, %36 : vector<128x128xi1>, vector<128x128xf32>
    %38 = math.exp %37 : vector<128x128xf32>
    %39 = arith.mulf %4, %38 : vector<128x128xf32>
    %40 = tpu.iota {dimensions = array<i32: 1>} : vector<128x128xi32>
    %c127_i32 = arith.constant 127 : i32
    %41 = vector.broadcast %c127_i32 : i32 to vector<128x128xi32>
    %42 = arith.cmpi eq, %40, %41 : vector<128x128xi32>
    %cst_20 = arith.constant 1.000000e+00 : f32
    %43 = vector.broadcast %cst_20 : f32 to vector<128x128xf32>
    %44 = arith.select %42, %43, %16 : vector<128x128xi1>, vector<128x128xf32>
    %cst_21 = arith.constant dense<0.000000e+00> : vector<128x128xf32>
    %45 = tpu.matmul %39, %44, %cst_21 {dimension_numbers = #tpu.dot_dimension_numbers<[1], [0], [0], [1], [0, 0, 1, 1], [], []>} : vector<128x128xf32>, vector<128x128xf32>, vector<128x128xf32> -> vector<128x128xf32>
    %c127_i32_22 = arith.constant 127 : i32
    %46 = vector.broadcast %c127_i32_22 : i32 to vector<128x128xi32>
    %47 = arith.cmpi eq, %40, %46 : vector<128x128xi32>
    %cst_23 = arith.constant 0.000000e+00 : f32
    %48 = vector.broadcast %cst_23 : f32 to vector<128x128xf32>
    %49 = arith.select %47, %45, %48 : vector<128x128xi1>, vector<128x128xf32>
    %cst_24 = arith.constant dense<0.000000e+00> : vector<128xf32>
    %50 = vector.multi_reduction <add>, %49, %cst_24 [1] : vector<128x128xf32> to vector<128xf32>
    %51 = vector.shape_cast %50 : vector<128xf32> to vector<128x1xf32>
    %cst_25 = arith.constant 0.000000e+00 : f32
    %52 = vector.broadcast %cst_25 : f32 to vector<128x1xf32>
    %53 = arith.cmpf ogt, %51, %52 : vector<128x1xf32>
    %cst_26 = arith.constant 1.000000e+00 : f32
    %54 = vector.broadcast %cst_26 : f32 to vector<128x1xf32>
    %55 = arith.select %53, %51, %54 : vector<128x1xi1>, vector<128x1xf32>
    %56 = tpu.reciprocal %55 {approx = true} : vector<128x1xf32> -> vector<128x1xf32>
    %cst_27 = arith.constant 0.000000e+00 : f32
    %57 = vector.broadcast %cst_27 : f32 to vector<128x1xf32>
    %58 = arith.cmpf ogt, %51, %57 : vector<128x1xf32>
    %c127_i32_28 = arith.constant 127 : i32
    %59 = vector.broadcast %c127_i32_28 : i32 to vector<128x128xi32>
    %60 = arith.cmpi ne, %40, %59 : vector<128x128xi32>
    %61 = vector.broadcast %58 : vector<128x1xi1> to vector<128x128xi1>
    %62 = arith.andi %61, %60 : vector<128x128xi1>
    %63 = vector.broadcast %56 : vector<128x1xf32> to vector<128x128xf32>
    %64 = arith.mulf %45, %63 : vector<128x128xf32>
    %cst_29 = arith.constant 0.000000e+00 : f32
    %65 = vector.broadcast %cst_29 : f32 to vector<128x128xf32>
    %66 = arith.select %62, %64, %65 : vector<128x128xi1>, vector<128x128xf32>
    %67 = arith.addf %66, %17 : vector<128x128xf32>
    %c2_i32 = arith.constant 2 : i32
    %68 = arith.cmpi eq, %arg0, %c2_i32 : i32
    %cst_30 = arith.constant 0.000000e+00 : f32
    %69 = vector.broadcast %cst_30 : f32 to vector<128x128xf32>
    %70 = arith.maximumf %67, %69 : vector<128x128xf32>
    %71 = arith.select %68, %67, %70 : vector<128x128xf32>
    %c0_31 = arith.constant 0 : index
    %c0_32 = arith.constant 0 : index
    %72 = vector.load %arg6[%c0_31, %c0_32] : memref<128x128xf32, #tpu.memory_space<vmem>>, vector<128x128xf32>
    tpu.vector_store %arg6[%c0_31, %c0_32], %71 {strides = array<i32>} : memref<128x128xf32, #tpu.memory_space<vmem>>, vector<128x128xf32>,
    return
  }
  func.func @transform_0(%arg0: i32) -> (i32, i32) {
    %c0_i32 = arith.constant 0 : i32
    %c0_i32_0 = arith.constant 0 : i32
    %c0_i32_1 = arith.constant 0 : i32
    return %c0_i32, %c0_i32_0 : i32, i32
  }
  func.func @transform_1(%arg0: i32) -> (i32, i32) {
    %c0_i32 = arith.constant 0 : i32
    %c0_i32_0 = arith.constant 0 : i32
    %c0_i32_1 = arith.constant 0 : i32
    return %c0_i32, %c0_i32_0 : i32, i32
  }
  func.func @transform_2(%arg0: i32) -> (i32, i32, i32) {
    %c0_i32 = arith.constant 0 : i32
    %c0_i32_0 = arith.constant 0 : i32
    %c0_i32_1 = arith.constant 0 : i32
    return %arg0, %c0_i32, %c0_i32_0 : i32, i32, i32
  }
  func.func @transform_3(%arg0: i32) -> (i32, i32, i32) {
    %c0_i32 = arith.constant 0 : i32
    %c0_i32_0 = arith.constant 0 : i32
    %c0_i32_1 = arith.constant 0 : i32
    return %arg0, %c0_i32, %c0_i32_0 : i32, i32, i32
  }
  func.func @transform_4(%arg0: i32) -> (i32, i32, i32) {
    %c0_i32 = arith.constant 0 : i32
    %c0_i32_0 = arith.constant 0 : i32
    %c0_i32_1 = arith.constant 0 : i32
    return %arg0, %c0_i32, %c0_i32_0 : i32, i32, i32
  }
  func.func @transform_5(%arg0: i32) -> (i32, i32) {
    %c0_i32 = arith.constant 0 : i32
    %c0_i32_0 = arith.constant 0 : i32
    %c0_i32_1 = arith.constant 0 : i32
    return %c0_i32, %c0_i32_0 : i32, i32
  }
}

</mosaic_0001>

<bundles_post_ra>
// kernel: tpu_custom_call.1
= control target key start
LH: loop header
LB: loop body
LE: loop exit
PB: predicated region body
PF: predicated region fallthrough
CT: control target
= control target key end

     0   :  { %s2845_s0 = inlined_call_operand.hbm [shape: f32[128,128], index: 0, kind: input, shape index: {}]   ;;  %s2846_s1 = inlined_call_operand.hbm [shape: f32[128,128], index: 1, kind: input, shape index: {}]   ;;  %s2847_s2 = inlined_call_operand.hbm [shape: f32[3,128,256], index: 2, kind: input, shape index: {}]   ;;  %s2848_s3 = inlined_call_operand.hbm [shape: f32[3,1,256], index: 3, kind: input, shape index: {}]   ;;  %s2849_s4 = inlined_call_operand.hbm [shape: f32[3,1,128], index: 4, kind: input, shape index: {}]   ;;  %s2850_s5 = inlined_call_operand.hbm [shape: f32[128,128], index: 5, kind: output, shape index: {}]  }
   0x1   :  { %2864 = sst [smem:[#allocation16_spill]] %s2845_s0 }
   0x2   :  { %10 = vsyncpa [#allocation3], 0 }
   0x3   :  { %11 = vsyncpa [#allocation6], 0 }
   0x4   :  { %12 = vsyncpa [#allocation4], 0  ;;  %s1988_s18 = smov 0   ;;  %s1990_s19 = smov 0  }
   0x5   :  { %s1992_s20 = smov 0   ;;  %s1994_s21 = smov 0  }
   0x6 LB: > { %s2007_s22 = sadd.s32 4294967295, %s1943_s21   ;;  %s2010_s23 = sadd.s32 1, %s1943_s21   ;;  %s1943_s21 = sphi %s1994_s21, %s2910_s21   ;;  %s1939_s20 = sphi %s1992_s20, %s2909_s20   ;;  %s1935_s19 = sphi %s1990_s19, %s2908_s19   ;;  %s1931_s18 = sphi %s1988_s18, %s2907_s18  }
   0x7   : > { %s64_s24 = ssub.s32 %s1943_s21, %s2010_s23  ;;  %s67_s25 = sadd.s32 1, %s1939_s20 }
   0x8   : > { %p65_p0 = scmp.eq.s32.totalorder %s64_s24, 0  ;;  %p74_p1 = scmp.ne.s32.totalorder %s1939_s20, %s1935_s19 }
   0x9   : > { %p75_p2 = scmp.eq.s32.totalorder %s1943_s21, 0  ;;  %p80_p3 = scmp.ne.s32.totalorder %s1935_s19, %s1931_s18 }
   0xa   : > { %s2020_s26 = scalar_select %p65_p0, %s1939_s20, %s67_s25  }
   0xb   : > { %p2022_p4 = por %p75_p2, %p74_p1  ;;  %p2851_p5 = scmp.eq.s32.totalorder %s2007_s22, 0 }
   0xc   : > { %2865 = sst [smem:[#allocation15_spill]] %s2020_s26  ;;  %p1401_p6 = scmp.ge.s32.totalorder %s1943_s21, 1 }
   0xd   : > { %p164_p7 = scmp.lt.s32.totalorder %s1943_s21, 4  ;;  %p2031_p8 = por %p2851_p5, %p80_p3 }
   0xe   : > { %s1945_s30 = smov [#allocation2]   ;;  %p1614_p13 = scmp.lt.s32.totalorder %s1943_s21, 3 }
   0xf   : > { %s2867_s28 = scalar_select %p2031_p8, 1, 0 }
  0x10   : > { %p2036_p10 = pnand %p1401_p6, %p164_p7  ;;  %s176_s6 = sshll.u32 %s1945_s30, 4  ;;  %s177_s6 = int_to_ptr.vmem [resolvable:$true] %s176_s6 }
  0x11   : > { %s203_s8 = sand.u32 1, %s1943_s21   ;;  %s2051_s9 = sand.u32 1, %s1939_s20  }
  0x12   : > { %s2868_s29 = scalar_select %p2036_p10, 1, 0 }
  0x13   : > { %p1595_p11 = pneg %p2036_p10  ;;  %p2055_p0 = pnand %p1614_p13, %p2022_p4 }
  0x14   : > { %s2871_s0 = sld [smem:[#allocation16_spill]] }
  0x15   : > { %p2044_p12 = pnand %p1595_p11, %p2851_p5 }
  0x16   : > { %s2870_s10 = scalar_select %p2055_p0, 1, 0 }
  0x17   : > { %s2869_s7 = scalar_select %p2044_p12, 1, 0 }
  0x18   : > { %p2855_p2 = pneg %p2044_p12 }
  0x1a   : > { %s1725_s13 = scalar_lea.hbm %s2871_s0, 2048 }
  0x1b   : > { %p1726_p1 = scmp.ne.s32.totalorder %s2871_s0, %s1725_s13  ;;  %p1732_p4 = scmp.lt.u32.totalorder %s1725_s13, %s2871_s0 }
  0x1d   : > { %p1728_p3 = pnand %p2855_p2, %p1726_p1 }
  0x1f   : > { %p1729_p6 = pneg %p1728_p3 }
  0x21   : > { %p1734_p7 = pnand %p1732_p4, %p1729_p6 }
  0x23   : > { %1737 = shalt.err (!%p1734_p7)
}
  0x24   : > { %s1738_s18 = scalar_lea.vmem %s177_s6, 2048  ;;  %p1746_p5 = scmp.lt.s32.totalorder %s177_s6, %s177_s6 }
  0x25   : > { %p1739_p11 = scmp.ne.s32.totalorder %s177_s6, %s1738_s18  ;;  %p1747_p8 = scmp.lt.s32.totalorder %s1738_s18, %s1738_s18 }
  0x27   : > { %p1741_p13 = pnand %p1739_p11, %p2855_p2  ;;  %p1748_p10 = por %p1747_p8, %p1746_p5 }
  0x29   : > { %p1742_p9 = pneg %p1741_p13 }
  0x2b   : > { %p1749_p0 = pnand %p1748_p10, %p1742_p9 }
  0x2d   : > { %1752 = shalt.err (!%p1749_p0)
}
  0x2e   : > { %s2858_s24 = smov 128   ;;  %s2859_s25 = smov 8  }
  0x2f   : > { %1598 = dma.hbm_to_vmem [thread:$0]  (!%p2044_p12), %s2871_s0, 2048, %s177_s6, [#allocation3], %s2858_s24, %s2858_s24, %s2859_s25  }
  0x30   : > { %s1405_s11 = sshll.u32 %s2051_s9, 8  ;;  %s1423_s12 = sshll.u32 %s1943_s21, 12 }
  0x31   : > { %s2089_s15 = scalar_lea.hbm %s2847_s2, %s1423_s12  ;;  %s207_s16 = scalar_lea.vmem [#allocation7], %s1405_s11 }
  0x32   : > { %s214_s17 = sshll.u32 %s207_s16, 4  ;;  %s2093_s18 = scalar_lea.sflag [#allocation3], %s203_s8  ;;  %s2091_s17 = int_to_ptr.vmem [resolvable:$true] %s214_s17 }
  0x33   : > { %s1753_s26 = scalar_lea.hbm %s2089_s15, 4096  ;;  %p2872_p8 = scmp.ne.s32.totalorder %s2870_s10, 0 }
  0x34   : > { %p1754_p5 = scmp.ne.s32.totalorder %s2089_s15, %s1753_s26  ;;  %s1758_s11 = scalar_lea.hbm %s2847_s2, 12288 }
  0x35   : > { %p2099_p9 = pneg %p2872_p8  ;;  %p1759_p1 = scmp.lt.u32.totalorder %s2089_s15, %s2847_s2 }
  0x36   : > { %p1760_p3 = scmp.lt.u32.totalorder %s1758_s11, %s1753_s26  ;;  %p1762_p4 = scmp.lt.u32.totalorder %s1753_s26, %s2089_s15 }
  0x37   : > { %s2873_s6 = scalar_select %p2099_p9, 1, 0 }
  0x38   : > { %p1756_p10 = pnand %p2099_p9, %p1754_p5  ;;  %p1761_p6 = por %p1760_p3, %p1759_p1 }
  0x3a   : > { %p1757_p0 = pneg %p1756_p10  ;;  %p1763_p7 = por %p1762_p4, %p1761_p6 }
  0x3c   : > { %p1764_p11 = pnand %p1763_p7, %p1757_p0 }
  0x3e   : > { %1767 = shalt.err (!%p1764_p11)
}
  0x3f   : > { %s1768_s8 = scalar_lea.vmem %s2091_s17, 4096  ;;  %s1948_s14 = smov [#allocation7]  }
  0x40   : > { %p1769_p13 = scmp.ne.s32.totalorder %s2091_s17, %s1768_s8  ;;  %s1773_s16 = sshll.u32 %s1948_s14, 4  ;;  %s1774_s16 = int_to_ptr.vmem [resolvable:$false] %s1773_s16 }
  0x41   : > { %s1775_s27 = scalar_lea.vmem %s1774_s16, 8192  ;;  %p1776_p2 = scmp.lt.s32.totalorder %s2091_s17, %s1774_s16 }
  0x42   : > { %p1771_p5 = pnand %p1769_p13, %p2099_p9  ;;  %p1777_p12 = scmp.lt.s32.totalorder %s1775_s27, %s1768_s8 }
  0x44   : > { %p1772_p10 = pneg %p1771_p5  ;;  %p1778_p1 = por %p1777_p12, %p1776_p2 }
  0x46   : > { %p1779_p3 = pnand %p1778_p1, %p1772_p10 }
  0x48   : > { %1782 = shalt.err (!%p1779_p3)
}
  0x49   : > { %s1949_s26 = smov 256   ;;  %s1950_s30 = smov 16  }
  0x4a   : > { %1605 = dma.hbm_to_vmem [thread:$0]  (!%p2872_p8), %s2089_s15, 4096, %s2091_s17, %s2093_s18, %s1949_s26, %s1949_s26, %s1950_s30  }
  0x4b   : > { %s1408_s11 = sshll.u32 %s2051_s9, 1  ;;  %s1424_s12 = sshll.u32 %s1943_s21, 5 }
  0x4c   : > { %s2128_s8 = scalar_lea.hbm %s2848_s3, %s1424_s12  ;;  %s228_s16 = scalar_lea.vmem [#allocation8], %s1408_s11 }
  0x4d   : > { %s236_s27 = sshll.u32 %s228_s16, 4  ;;  %s1951_s24 = smov [#allocation5]   ;;  %s2130_s27 = int_to_ptr.vmem [resolvable:$true] %s236_s27 }
  0x4e   : > { %s189_s25 = sshll.u32 %s1951_s24, 4  ;;  %s1783_s0 = scalar_lea.hbm %s2128_s8, 32  ;;  %s190_s25 = int_to_ptr.vmem [resolvable:$true] %s189_s25 }
  0x4f   : > { %p1784_p12 = scmp.ne.s32.totalorder %s2128_s8, %s1783_s0  ;;  %s1788_s26 = scalar_lea.hbm %s2848_s3, 96 }
  0x50   : > { %p1789_p6 = scmp.lt.u32.totalorder %s2128_s8, %s2848_s3  ;;  %p1790_p4 = scmp.lt.u32.totalorder %s1788_s26, %s1783_s0 }
  0x51   : > { %p1786_p2 = pnand %p1784_p12, %p2099_p9  ;;  %p1792_p11 = scmp.lt.u32.totalorder %s1783_s0, %s2128_s8 }
  0x52   : > { %p1791_p7 = por %p1790_p4, %p1789_p6 }
  0x53   : > { %p1787_p0 = pneg %p1786_p2 }
  0x54   : > { %p1793_p13 = por %p1792_p11, %p1791_p7 }
  0x56   : > { %p1794_p5 = pnand %p1793_p13, %p1787_p0 }
  0x58   : > { %1797 = shalt.err (!%p1794_p5)
}
  0x59   : > { %s1798_s24 = scalar_lea.vmem %s2130_s27, 32  ;;  %s1952_s11 = smov [#allocation8]  }
  0x5a   : > { %p1799_p10 = scmp.ne.s32.totalorder %s2130_s27, %s1798_s24  ;;  %s1803_s13 = sshll.u32 %s1952_s11, 4  ;;  %s1804_s13 = int_to_ptr.vmem [resolvable:$false] %s1803_s13 }
  0x5b   : > { %s1805_s14 = scalar_lea.vmem %s1804_s13, 64  ;;  %p1806_p12 = scmp.lt.s32.totalorder %s2130_s27, %s1804_s13 }
  0x5c   : > { %p1801_p1 = pnand %p1799_p10, %p2099_p9  ;;  %p1807_p2 = scmp.lt.s32.totalorder %s1805_s14, %s1798_s24 }
  0x5e   : > { %p1802_p3 = pneg %p1801_p1  ;;  %p1808_p6 = por %p1807_p2, %p1806_p12 }
  0x60   : > { %p1809_p4 = pnand %p1808_p6, %p1802_p3 }
  0x62   : > { %1812 = shalt.err (!%p1809_p4)
}
  0x63   : > { %1608 = dma.hbm_to_vmem [thread:$0]  (!%p2872_p8), %s2128_s8, 32, %s2130_s27, %s2093_s18  }
  0x64   : > { %s1813_s15 = scalar_lea.hbm %s2846_s1, 2048  ;;  %p2874_p7 = scmp.ne.s32.totalorder %s2869_s7, 0 }
  0x65   : > { %p1814_p0 = scmp.ne.s32.totalorder %s2846_s1, %s1813_s15  ;;  %p1820_p10 = scmp.lt.u32.totalorder %s1813_s15, %s2846_s1 }
  0x66   : > { %p2875_p11 = pneg %p2874_p7 }
  0x68   : > { %p1816_p13 = pnand %p1814_p0, %p2875_p11 }
  0x6a   : > { %p1817_p5 = pneg %p1816_p13 }
  0x6c   : > { %p1822_p1 = pnand %p1820_p10, %p1817_p5 }
  0x6e   : > { %1825 = shalt.err (!%p1822_p1)
}
  0x6f   : > { %s1826_s8 = scalar_lea.vmem %s190_s25, 2048  ;;  %p2876_p12 = pmov %p2875_p11 }
  0x70   : > { %p1827_p3 = scmp.ne.s32.totalorder %s190_s25, %s1826_s8  ;;  %p1834_p4 = scmp.lt.s32.totalorder %s190_s25, %s190_s25 }
  0x71   : > { %p1835_p8 = scmp.lt.s32.totalorder %s1826_s8, %s1826_s8 }
  0x72   : > { %p1829_p2 = pnand %p1827_p3, %p2876_p12 }
  0x73   : > { %p1836_p9 = por %p1835_p8, %p1834_p4 }
  0x74   : > { %p1830_p6 = pneg %p1829_p2 }
  0x76   : > { %p1837_p0 = pnand %p1836_p9, %p1830_p6 }
  0x78   : > { %1840 = shalt.err (!%p1837_p0)
}
  0x79   : > { %s2877_s27 = smov 8   ;;  %s2878_s24 = smov 128  }
  0x7a   : > { %1601 = dma.hbm_to_vmem [thread:$0]  (!%p2874_p7), %s2846_s1, 2048, %s190_s25, [#allocation6], %s2878_s24, %s2878_s24, %s2877_s27  }
  0x7b   : > { %s1411_s14 = sshll.u32 %s1943_s21, 4  ;;  %s246_s0 = scalar_lea.vmem [#allocation9], %s2051_s9 }
  0x7c   : > { %s253_s16 = sshll.u32 %s246_s0, 4  ;;  %s251_s26 = scalar_lea.hbm %s2849_s4, %s1411_s14  ;;  %s254_s16 = int_to_ptr.vmem [resolvable:$true] %s253_s16 }
  0x7d   : > { %s1841_s30 = scalar_lea.hbm %s251_s26, 16  ;;  %p2879_p9 = scmp.ne.s32.totalorder %s2873_s6, 0 }
  0x7e   : > { %p1842_p8 = scmp.ne.s32.totalorder %s251_s26, %s1841_s30  ;;  %s1846_s8 = scalar_lea.hbm %s2849_s4, 48 }
  0x7f   : > { %p1847_p7 = scmp.lt.u32.totalorder %s251_s26, %s2849_s4  ;;  %p1848_p5 = scmp.lt.u32.totalorder %s1846_s8, %s1841_s30 }
  0x80   : > { %p1844_p11 = pnand %p1842_p8, %p2879_p9  ;;  %p1850_p1 = scmp.lt.u32.totalorder %s1841_s30, %s251_s26 }
  0x81   : > { %p1849_p10 = por %p1848_p5, %p1847_p7 }
  0x82   : > { %p1845_p13 = pneg %p1844_p11 }
  0x83   : > { %p1851_p3 = por %p1850_p1, %p1849_p10 }
  0x85   : > { %p1852_p12 = pnand %p1851_p3, %p1845_p13 }
  0x87   : > { %1855 = shalt.err (!%p1852_p12)
}
  0x88   : > { %s1856_s21 = scalar_lea.vmem %s254_s16, 16  ;;  %s1953_s9 = smov [#allocation9]  }
  0x89   : > { %p1857_p2 = scmp.ne.s32.totalorder %s254_s16, %s1856_s21  ;;  %s1861_s25 = sshll.u32 %s1953_s9, 4  ;;  %s1862_s25 = int_to_ptr.vmem [resolvable:$false] %s1861_s25 }
  0x8a   : > { %s1863_s27 = scalar_lea.vmem %s1862_s25, 32  ;;  %p1864_p0 = scmp.lt.s32.totalorder %s254_s16, %s1862_s25 }
  0x8b   : > { %p1859_p6 = pnand %p1857_p2, %p2879_p9  ;;  %p1865_p8 = scmp.lt.s32.totalorder %s1863_s27, %s1856_s21 }
  0x8d   : > { %p1860_p4 = pneg %p1859_p6  ;;  %p1866_p11 = por %p1865_p8, %p1864_p0 }
  0x8f   : > { %p1867_p5 = pnand %p1866_p11, %p1860_p4 }
  0x91   : > { %1870 = shalt.err (!%p1867_p5)
}
  0x92   : > { %p2880_p7 = scmp.ne.s32.totalorder %s2870_s10, 0  ;;  %p2881_p13 = scmp.ne.s32.totalorder %s2868_s29, 0 }
  0x93   : > { %p2882_p10 = scmp.eq.s32.totalorder (!%p2881_p13), %s2007_s22, 0 }
  0x94   : > { %1611 = dma.hbm_to_vmem [thread:$0]  (!%p2880_p7), %s251_s26, 16, %s254_s16, %s2093_s18  }
  0x95   : > { %262 = sbr.rel (%p2881_p13) target bundleno = 1320 (0x528), region = 40 }
  0x9c   : > { %1914 = dma.done.wait (%p2882_p10), [#allocation3], 2048   ;;  %p2883_p9 = pmov %p2882_p10 }
  0x9e   : > { %1916 = vsyncadd (%p2883_p9), [#allocation3], 4294965248  ;;  %p2884_p1 = pmov %p2883_p9 }
  0xa0   : > { %1918 = dma.done.wait (%p2884_p1), [#allocation6], 2048   ;;  %p2885_p3 = pmov %p2884_p1 }
  0xa1   : > { %s272_s10 = sand.u32 1, %s2007_s22   ;;  %s2207_s18 = sand.u32 1, %s1935_s19  }
  0xa2   : > { %1920 = vsyncadd (%p2885_p3), [#allocation6], 4294965248  ;;  %s1415_s29 = sshll.u32 %s2207_s18, 8  ;;  %s273_s6 = scalar_lea.sflag [#allocation3], %s272_s10 }
  0xa3   : > { %s2210_s24 = scalar_lea.vmem [#allocation7], %s1415_s29  ;;  %p2886_p12 = scmp.ne.s32.totalorder %s2867_s28, 0 }
  0xa5   : > { %1922 = dma.done.wait (%p2886_p12), %s273_s6, 4144  }
  0xa6   : > { %1924 = vsyncadd (%p2886_p12), %s273_s6, 4294963152  ;;  %s1416_s14 = sshll.u32 %s2207_s18, 1  ;;  %s293_s16 = scalar_lea.vmem [#allocation9], %s2207_s18 }
  0xa7   : > { %s2217_s0 = scalar_lea.vmem [#allocation8], %s1416_s14  ;;  %p2887_p2 = scmp.ne.s32.totalorder %s2007_s22, 0 }
  0xa8   : > { %v328_v0 = vld [vmem:[#allocation2] sm:$0xff] (!%p2887_p2)  ;;  %v329_v1 = vld [vmem:[#allocation2 + $0x8] sm:$0xff] (!%p2887_p2)  ;;  %v330_v2 = vld [vmem:[#allocation2 + $0x10] sm:$0xff] (!%p2887_p2) }
  0xa9   : > { %327 = sbr.rel (%p2887_p2) target bundleno = 177 (0xb1), region = 64  ;;  %344 = vst [vmem:[#allocation10] sm:$0xff] (!%p2887_p2), %v328_v0  ;;  %345 = vst [vmem:[#allocation10 + $0x8] sm:$0xff] (!%p2887_p2), %v329_v1  ;;  %v331_v3 = vld [vmem:[#allocation2 + $0x18] sm:$0xff] (!%p2887_p2)  ;;  %v332_v4 = vld [vmem:[#allocation2 + $0x20] sm:$0xff] (!%p2887_p2) }
  0xaa   : > { %346 = vst [vmem:[#allocation10 + $0x10] sm:$0xff] (!%p2887_p2), %v330_v2  ;;  %v333_v5 = vld [vmem:[#allocation2 + $0x28] sm:$0xff] (!%p2887_p2)  ;;  %347 = vst [vmem:[#allocation10 + $0x18] sm:$0xff] (!%p2887_p2), %v331_v3  ;;  %v334_v6 = vld [vmem:[#allocation2 + $0x30] sm:$0xff] (!%p2887_p2) }
  0xab   : > { %348 = vst [vmem:[#allocation10 + $0x20] sm:$0xff] (!%p2887_p2), %v332_v4  ;;  %349 = vst [vmem:[#allocation10 + $0x28] sm:$0xff] (!%p2887_p2), %v333_v5  ;;  %v335_v7 = vld [vmem:[#allocation2 + $0x38] sm:$0xff] (!%p2887_p2)  ;;  %v336_v8 = vld [vmem:[#allocation2 + $0x40] sm:$0xff] (!%p2887_p2) }
  0xac   : > { %350 = vst [vmem:[#allocation10 + $0x30] sm:$0xff] (!%p2887_p2), %v334_v6  ;;  %351 = vst [vmem:[#allocation10 + $0x38] sm:$0xff] (!%p2887_p2), %v335_v7  ;;  %v337_v9 = vld [vmem:[#allocation2 + $0x48] sm:$0xff] (!%p2887_p2)  ;;  %v338_v10 = vld [vmem:[#allocation2 + $0x50] sm:$0xff] (!%p2887_p2) }
  0xad   : > { %352 = vst [vmem:[#allocation10 + $0x40] sm:$0xff] (!%p2887_p2), %v336_v8  ;;  %v339_v11 = vld [vmem:[#allocation2 + $0x58] sm:$0xff] (!%p2887_p2)  ;;  %353 = vst [vmem:[#allocation10 + $0x48] sm:$0xff] (!%p2887_p2), %v337_v9  ;;  %v340_v12 = vld [vmem:[#allocation2 + $0x60] sm:$0xff] (!%p2887_p2) }
  0xae   : > { %354 = vst [vmem:[#allocation10 + $0x50] sm:$0xff] (!%p2887_p2), %v338_v10  ;;  %355 = vst [vmem:[#allocation10 + $0x58] sm:$0xff] (!%p2887_p2), %v339_v11  ;;  %v341_v13 = vld [vmem:[#allocation2 + $0x68] sm:$0xff] (!%p2887_p2)  ;;  %v342_v14 = vld [vmem:[#allocation2 + $0x70] sm:$0xff] (!%p2887_p2) }
  0xaf   : > { %356 = vst [vmem:[#allocation10 + $0x60] sm:$0xff] (!%p2887_p2), %v340_v12  ;;  %357 = vst [vmem:[#allocation10 + $0x68] sm:$0xff] (!%p2887_p2), %v341_v13  ;;  %v343_v15 = vld [vmem:[#allocation2 + $0x78] sm:$0xff] (!%p2887_p2) }
  0xb0   : > { %358 = vst [vmem:[#allocation10 + $0x70] sm:$0xff] %v342_v14  ;;  %359 = vst [vmem:[#allocation10 + $0x78] sm:$0xff] %v343_v15 }
  0xb1 PF: > { %v409_v16 = vld [vmem:[%s2210_s24 + $0x8] sm:$0xff]  ;;  %v411_v17 = vld [vmem:[%s2210_s24 + $0x18] sm:$0xff]  ;;  %v408_v18 = vld [vmem:[%s2210_s24] sm:$0xff]  ;;  %v1954_v23 = vmov 0.0   ;;  %p1233_p6 = scmp.eq.s32.totalorder %s2007_s22, 2  ;;  %s1955_s15 = smov [#allocation10]  }
  0xb2   : > { %v1513_v19 = vpack.c.bf16 %v411_v17, %v409_v16  ;;  %v410_v20 = vld [vmem:[%s2210_s24 + $0x10] sm:$0xff]  ;;  %v413_v21 = vld [vmem:[%s2210_s24 + $0x28] sm:$0xff]  ;;  %v415_v22 = vld [vmem:[%s2210_s24 + $0x38] sm:$0xff]  ;;  %517 = vmatprep.mubr.f32.mxu0 %v1954_v23  ;;  %v443_v17 = vlaneseq  ;;  %s1291_s17 = sshll.u32 %s1955_s15, 4  ;;  %s1292_s17 = int_to_ptr.vmem [resolvable:$true] %s1291_s17 }
  0xb3   : > { %v1515_v24 = vpack.c.bf16 %v410_v20, %v408_v18  ;;  %v1517_v25 = vpack.c.bf16 %v415_v22, %v413_v21  ;;  %v412_v26 = vld [vmem:[%s2210_s24 + $0x20] sm:$0xff]  ;;  %v414_v27 = vld [vmem:[%s2210_s24 + $0x30] sm:$0xff]  ;;  %v417_v28 = vld [vmem:[%s2210_s24 + $0x48] sm:$0xff]  ;;  %s1250_s28 = scalar_select %p1233_p6, 1, 0 }
  0xb4   : > { %1514 = vmatprep.subr.bf16.mxu0 %v1513_v19  ;;  %v419_v29 = vld [vmem:[%s2210_s24 + $0x58] sm:$0xff]  ;;  %v1519_v30 = vpack.c.bf16 %v414_v27, %v412_v26  ;;  %v416_v32 = vld [vmem:[%s2210_s24 + $0x40] sm:$0xff]  ;;  %v418_v33 = vld [vmem:[%s2210_s24 + $0x50] sm:$0xff]  ;;  %v2270_v18 = vshrl.u32 %v443_v17, 7  ;;  %s1871_s26 = scalar_lea.vmem %s1292_s17, 2048  ;;  %p1878_p11 = scmp.lt.s32.totalorder %s1292_s17, %s1292_s17 }
  0xb5   : > { %1516 = vmatpush1.bf16.msra.mxu0 %v1515_v24  ;;  %v1521_v31 = vpack.c.bf16 %v419_v29, %v417_v28  ;;  %v421_v34 = vld [vmem:[%s2210_s24 + $0x68] sm:$0xff]  ;;  %v423_v35 = vld [vmem:[%s2210_s24 + $0x78] sm:$0xff]  ;;  %v1523_v36 = vpack.c.bf16 %v418_v33, %v416_v32  ;;  %v420_v38 = vld [vmem:[%s2210_s24 + $0x60] sm:$0xff]  ;;  %v2279_v24 = vand.u32 127, %v443_v17  ;;  %p1872_p4 = scmp.ne.s32.totalorder %s1292_s17, %s1871_s26  ;;  %p1879_p5 = scmp.lt.s32.totalorder %s1871_s26, %s1871_s26 }
  0xb6   : > { %1518 = vmatprep.subr.bf16.mxu0 %v1517_v25  ;;  %v1525_v37 = vpack.c.bf16 %v423_v35, %v421_v34  ;;  %v422_v39 = vld [vmem:[%s2210_s24 + $0x70] sm:$0xff]  ;;  %v425_v40 = vld [vmem:[%s2210_s24 + $0x88] sm:$0xff]  ;;  %v427_v41 = vld [vmem:[%s2210_s24 + $0x98] sm:$0xff]  ;;  %v445_v19 = vsub.s32 0, %v2270_v18 }
  0xb7   : > { %v1527_v42 = vpack.c.bf16 %v422_v39, %v420_v38  ;;  %v1529_v43 = vpack.c.bf16 %v427_v41, %v425_v40  ;;  %v424_v44 = vld [vmem:[%s2210_s24 + $0x80] sm:$0xff]  ;;  %v426_v45 = vld [vmem:[%s2210_s24 + $0x90] sm:$0xff]  ;;  %v429_v46 = vld [vmem:[%s2210_s24 + $0xa8] sm:$0xff]  ;;  %vm2863_vm0 = vcmp.eq.s32.totalorder %v2279_v24, 127  ;;  %p1873_p0 = pnand %p1872_p4, %p1233_p6  ;;  %p1880_p7 = por %p1879_p5, %p1878_p11 }
  0xb8   : > { %v431_v47 = vld [vmem:[%s2210_s24 + $0xb8] sm:$0xff]  ;;  %v1531_v48 = vpack.c.bf16 %v426_v45, %v424_v44  ;;  %v428_v50 = vld [vmem:[%s2210_s24 + $0xa0] sm:$0xff]  ;;  %v430_v51 = vld [vmem:[%s2210_s24 + $0xb0] sm:$0xff] }
  0xb9   : > { %1520 = vmatpush1.bf16.msra.mxu0 %v1519_v30  ;;  %v1533_v49 = vpack.c.bf16 %v431_v47, %v429_v46  ;;  %v433_v52 = vld [vmem:[%s2210_s24 + $0xc8] sm:$0xff]  ;;  %v435_v53 = vld [vmem:[%s2210_s24 + $0xd8] sm:$0xff]  ;;  %v1535_v54 = vpack.c.bf16 %v430_v51, %v428_v50  ;;  %v432_v56 = vld [vmem:[%s2210_s24 + $0xc0] sm:$0xff]  ;;  %p1874_p8 = pneg %p1873_p0 }
  0xba   : > { %1522 = vmatprep.subr.bf16.mxu0 %v1521_v31  ;;  %v1537_v55 = vpack.c.bf16 %v435_v53, %v433_v52  ;;  %v434_v57 = vld [vmem:[%s2210_s24 + $0xd0] sm:$0xff]  ;;  %v437_v58 = vld [vmem:[%s2210_s24 + $0xe8] sm:$0xff]  ;;  %v439_v59 = vld [vmem:[%s2210_s24 + $0xf8] sm:$0xff] }
  0xbb   : > { %v1539_v60 = vpack.c.bf16 %v434_v57, %v432_v56  ;;  %v1541_v61 = vpack.c.bf16 %v439_v59, %v437_v58  ;;  %v436_v62 = vld [vmem:[%s2210_s24 + $0xe0] sm:$0xff]  ;;  %v438_v63 = vld [vmem:[%s2210_s24 + $0xf0] sm:$0xff]  ;;  %p1881_p13 = pnand %p1880_p7, %p1874_p8 }
  0xbc   : > { %v1543_v0 = vpack.c.bf16 %v438_v63, %v436_v62  ;;  %v360_v1 = vld [vmem:[#allocation10] sm:$0xff]  ;;  %v361_v2 = vld [vmem:[#allocation10 + $0x8] sm:$0xff]  ;;  %v362_v3 = vld [vmem:[#allocation10 + $0x10] sm:$0xff] }
  0xbd   : > { %1524 = vmatpush1.bf16.msra.mxu0 %v1523_v36  ;;  %v363_v4 = vld [vmem:[#allocation10 + $0x18] sm:$0xff]  ;;  %v364_v5 = vld [vmem:[#allocation10 + $0x20] sm:$0xff]  ;;  %v365_v6 = vld [vmem:[#allocation10 + $0x28] sm:$0xff] }
  0xbe   : > { %1526 = vmatprep.subr.bf16.mxu0 %v1525_v37  ;;  %v366_v7 = vld [vmem:[#allocation10 + $0x30] sm:$0xff]  ;;  %v367_v8 = vld [vmem:[#allocation10 + $0x38] sm:$0xff]  ;;  %v368_v9 = vld [vmem:[#allocation10 + $0x40] sm:$0xff] }
  0xbf   : > { %v369_v10 = vld [vmem:[#allocation10 + $0x48] sm:$0xff]  ;;  %v370_v11 = vld [vmem:[#allocation10 + $0x50] sm:$0xff]  ;;  %v371_v12 = vld [vmem:[#allocation10 + $0x58] sm:$0xff] }
  0xc0   : > { %v372_v13 = vld [vmem:[#allocation10 + $0x60] sm:$0xff]  ;;  %v373_v14 = vld [vmem:[#allocation10 + $0x68] sm:$0xff]  ;;  %v374_v15 = vld [vmem:[#allocation10 + $0x70] sm:$0xff] }
  0xc1   : > { %1528 = vmatpush1.bf16.msra.mxu0 %v1527_v42  ;;  %v375_v16 = vld [vmem:[#allocation10 + $0x78] sm:$0xff] }
  0xc2   : > { %1530 = vmatprep.subr.bf16.mxu0 %v1529_v43  ;;  %v2274_v20 = vld [vmem:[%s2217_s0] sm:$0x3] }
  0xc3   : > { %v2277_v21 = vrot.slane %v2274_v20, %v445_v19  ;;  %v2283_v25 = vld [vmem:[%s293_s16] ss:$0 sm:$0xff] }
  0xc5   : > { %1532 = vmatpush1.bf16.msra.mxu0 %v1531_v48 }
  0xc6   : > { %1534 = vmatprep.subr.bf16.mxu0 %v1533_v49 }
  0xc9   : > { %1536 = vmatpush1.bf16.msra.mxu0 %v1535_v54 }
  0xca   : > { %1538 = vmatprep.subr.bf16.mxu0 %v1537_v55 }
  0xcd   : > { %1540 = vmatpush1.bf16.msra.mxu0 %v1539_v60 }
  0xce   : > { %1542 = vmatprep.subr.bf16.mxu0 %v1541_v61 }
  0xd1   : > { %1544 = vmatpush1.bf16.msra.mxu0 %v1543_v0 }
  0xd4   : > { %518 = vmatmul.mubr.f32.vlgmr.msra.gmra.mrb[0].mxu0 %v360_v1 }
  0xd5   : > { %523 = vmatprep.mubr.f32.mxu0 %v1954_v23 }
  0xd8   : > { %524 = vmatmul.mubr.f32.gmra.mrb[2].mxu0 %v361_v2 }
  0xd9   : > { %529 = vmatprep.mubr.f32.mxu0 %v1954_v23 }
  0xdc   : > { %530 = vmatmul.mubr.f32.gmra.mrb[4].mxu0 %v362_v3 }
  0xdd   : > { %535 = vmatprep.mubr.f32.mxu0 %v1954_v23 }
  0xe0   : > { %536 = vmatmul.mubr.f32.gmra.mrb[6].mxu0 %v363_v4 }
  0xe1   : > { %541 = vmatprep.mubr.f32.mxu0 %v1954_v23 }
  0xe4   : > { %542 = vmatmul.mubr.f32.gmra.mrb[8].mxu0 %v364_v5 }
  0xe5   : > { %547 = vmatprep.mubr.f32.mxu0 %v1954_v23 }
  0xe8   : > { %548 = vmatmul.mubr.f32.gmra.mrb[10].mxu0 %v365_v6 }
  0xe9   : > { %553 = vmatprep.mubr.f32.mxu0 %v1954_v23 }
  0xec   : > { %554 = vmatmul.mubr.f32.gmra.mrb[12].mxu0 %v366_v7 }
  0xed   : > { %559 = vmatprep.mubr.f32.mxu0 %v1954_v23 }
  0xf0   : > { %560 = vmatmul.mubr.f32.gmra.mrb[14].mxu0 %v367_v8 }
  0xf1   : > { %565 = vmatprep.mubr.f32.mxu0 %v1954_v23 }
  0xf4   : > { %566 = vmatmul.mubr.f32.gmra.mrb[16].mxu0 %v368_v9 }
  0xf5   : > { %571 = vmatprep.mubr.f32.mxu0 %v1954_v23 }
  0xf8   : > { %572 = vmatmul.mubr.f32.gmra.mrb[18].mxu0 %v369_v10 }
  0xf9   : > { %577 = vmatprep.mubr.f32.mxu0 %v1954_v23 }
  0xfc   : > { %578 = vmatmul.mubr.f32.gmra.mrb[20].mxu0 %v370_v11 }
  0xfd   : > { %583 = vmatprep.mubr.f32.mxu0 %v1954_v23 }
 0x100   : > { %584 = vmatmul.mubr.f32.gmra.mrb[22].mxu0 %v371_v12 }
 0x101   : > { %589 = vmatprep.mubr.f32.mxu0 %v1954_v23 }
 0x104   : > { %590 = vmatmul.mubr.f32.gmra.mrb[24].mxu0 %v372_v13 }
 0x105   : > { %595 = vmatprep.mubr.f32.mxu0 %v1954_v23 }
 0x108   : > { %596 = vmatmul.mubr.f32.gmra.mrb[26].mxu0 %v373_v14 }
 0x109   : > { %601 = vmatprep.mubr.f32.mxu0 %v1954_v23 }
 0x10c   : > { %602 = vmatmul.mubr.f32.gmra.mrb[28].mxu0 %v374_v15 }
 0x10d   : > { %607 = vmatprep.mubr.f32.mxu0 %v1954_v23 }
 0x110   : > { %608 = vmatmul.mubr.f32.gmra.mrb[30].mxu0 %v375_v16 }
 0x1a7   : > { %v519_v22 = vpop.f32.mrb[0].mxu0 }
 0x1a8   : > { %v520_v23 = vadd.f32 %v519_v22, %v2277_v21  ;;  %v2286_v26 = vpop.f32.mrb[1].mxu0 }
 0x1aa   : > { %v620_v27 = vmul.f32 %v2283_v25, %v520_v23  ;;  %v879_v32 = vsel %vm2863_vm0, 1.0, %v520_v23 }
 0x1ab   : > { %v525_v28 = vpop.f32.mrb[2].mxu0 }
 0x1ac   : > { %v526_v29 = vadd.f32 %v525_v28, %v2277_v21  ;;  %v2291_v30 = vpop.f32.mrb[3].mxu0  ;;  %636 = vadd.xlane.f32.xlu0 %v620_v27 }
 0x1ae   : > { %v621_v31 = vmul.f32 %v2283_v25, %v526_v29  ;;  %v880_v33 = vsel %vm2863_vm0, 1.0, %v526_v29 }
 0x1af   : > { %v531_v34 = vpop.f32.mrb[4].mxu0  ;;  %v1545_v35 = vpack.c.bf16 %v880_v33, %v879_v32 }
 0x1b0   : > { %v532_v36 = vadd.f32 %v531_v34, %v2277_v21  ;;  %v2299_v37 = vpop.f32.mrb[5].mxu0  ;;  %638 = vadd.xlane.f32.xlu0 %v621_v31 }
 0x1b1   : > { %1546 = vmatprep.subr.bf16.mxu1 %v1545_v35 }
 0x1b2   : > { %1548 = vmatpush3.bf16.msra.mxu1 %v1545_v35  ;;  %v622_v38 = vmul.f32 %v2283_v25, %v532_v36  ;;  %v881_v42 = vsel %vm2863_vm0, 1.0, %v532_v36 }
 0x1b3   : > { %v537_v39 = vpop.f32.mrb[6].mxu0 }
 0x1b4   : > { %v538_v40 = vadd.f32 %v537_v39, %v2277_v21  ;;  %v2303_v41 = vpop.f32.mrb[7].mxu0  ;;  %640 = vadd.xlane.f32.xlu1 %v622_v38 }
 0x1b6   : > { %v882_v43 = vsel %vm2863_vm0, 1.0, %v538_v40  ;;  %v623_v44 = vmul.f32 %v2283_v25, %v538_v40 }
 0x1b7   : > { %v1549_v45 = vpack.c.bf16 %v882_v43, %v881_v42  ;;  %v543_v46 = vpop.f32.mrb[8].mxu0 }
 0x1b8   : > { %v544_v47 = vadd.f32 %v543_v46, %v2277_v21  ;;  %v2311_v48 = vpop.f32.mrb[9].mxu0  ;;  %642 = vadd.xlane.f32.xlu1 %v623_v44 }
 0x1b9   : > { %1550 = vmatprep.subr.bf16.mxu1 %v1549_v45 }
 0x1ba   : > { %1552 = vmatpush3.bf16.msra.mxu1 %v1549_v45  ;;  %v624_v49 = vmul.f32 %v2283_v25, %v544_v47  ;;  %v883_v53 = vsel %vm2863_vm0, 1.0, %v544_v47 }
 0x1bb   : > { %v549_v50 = vpop.f32.mrb[10].mxu0 }
 0x1bc   : > { %v550_v51 = vadd.f32 %v549_v50, %v2277_v21  ;;  %v2315_v52 = vpop.f32.mrb[11].mxu0  ;;  %644 = vadd.xlane.f32.xlu0 %v624_v49 }
 0x1be   : > { %v884_v54 = vsel %vm2863_vm0, 1.0, %v550_v51  ;;  %v625_v55 = vmul.f32 %v2283_v25, %v550_v51 }
 0x1bf   : > { %v1553_v56 = vpack.c.bf16 %v884_v54, %v883_v53  ;;  %v555_v57 = vpop.f32.mrb[12].mxu0 }
 0x1c0   : > { %v556_v58 = vadd.f32 %v555_v57, %v2277_v21  ;;  %v2323_v59 = vpop.f32.mrb[13].mxu0  ;;  %646 = vadd.xlane.f32.xlu1 %v625_v55 }
 0x1c1   : > { %1554 = vmatprep.subr.bf16.mxu1 %v1553_v56 }
 0x1c2   : > { %1556 = vmatpush3.bf16.msra.mxu1 %v1553_v56  ;;  %v626_v60 = vmul.f32 %v2283_v25, %v556_v58  ;;  %v885_v0 = vsel %vm2863_vm0, 1.0, %v556_v58 }
 0x1c3   : > { %v561_v61 = vpop.f32.mrb[14].mxu0 }
 0x1c4   : > { %v562_v62 = vadd.f32 %v561_v61, %v2277_v21  ;;  %v2327_v63 = vpop.f32.mrb[15].mxu0  ;;  %648 = vadd.xlane.f32.xlu0 %v626_v60 }
 0x1c6   : > { %v886_v1 = vsel %vm2863_vm0, 1.0, %v562_v62  ;;  %v627_v2 = vmul.f32 %v2283_v25, %v562_v62 }
 0x1c7   : > { %v1557_v3 = vpack.c.bf16 %v886_v1, %v885_v0  ;;  %v567_v4 = vpop.f32.mrb[16].mxu0 }
 0x1c8   : > { %v568_v5 = vadd.f32 %v567_v4, %v2277_v21  ;;  %v2335_v6 = vpop.f32.mrb[17].mxu0  ;;  %650 = vadd.xlane.f32.xlu1 %v627_v2 }
 0x1c9   : > { %1558 = vmatprep.subr.bf16.mxu1 %v1557_v3 }
 0x1ca   : > { %1560 = vmatpush3.bf16.msra.mxu1 %v1557_v3  ;;  %v628_v7 = vmul.f32 %v2283_v25, %v568_v5  ;;  %v887_v11 = vsel %vm2863_vm0, 1.0, %v568_v5 }
 0x1cb   : > { %v573_v8 = vpop.f32.mrb[18].mxu0 }
 0x1cc   : > { %v574_v9 = vadd.f32 %v573_v8, %v2277_v21  ;;  %v2339_v10 = vpop.f32.mrb[19].mxu0  ;;  %652 = vadd.xlane.f32.xlu0 %v628_v7 }
 0x1ce   : > { %v888_v12 = vsel %vm2863_vm0, 1.0, %v574_v9  ;;  %v629_v13 = vmul.f32 %v2283_v25, %v574_v9 }
 0x1cf   : > { %v1561_v14 = vpack.c.bf16 %v888_v12, %v887_v11  ;;  %v579_v15 = vpop.f32.mrb[20].mxu0 }
 0x1d0   : > { %v580_v16 = vadd.f32 %v579_v15, %v2277_v21  ;;  %v2347_v17 = vpop.f32.mrb[21].mxu0  ;;  %654 = vadd.xlane.f32.xlu1 %v629_v13 }
 0x1d1   : > { %1562 = vmatprep.subr.bf16.mxu1 %v1561_v14 }
 0x1d2   : > { %1564 = vmatpush3.bf16.msra.mxu1 %v1561_v14  ;;  %v630_v19 = vmul.f32 %v2283_v25, %v580_v16  ;;  %v889_v28 = vsel %vm2863_vm0, 1.0, %v580_v16 }
 0x1d3   : > { %v585_v22 = vpop.f32.mrb[22].mxu0 }
 0x1d4   : > { %v586_v23 = vadd.f32 %v585_v22, %v2277_v21  ;;  %v2351_v27 = vpop.f32.mrb[23].mxu0  ;;  %656 = vadd.xlane.f32.xlu0 %v630_v19 }
 0x1d6   : > { %v890_v29 = vsel %vm2863_vm0, 1.0, %v586_v23  ;;  %v631_v31 = vmul.f32 %v2283_v25, %v586_v23 }
 0x1d7   : > { %v1565_v32 = vpack.c.bf16 %v890_v29, %v889_v28  ;;  %v591_v33 = vpop.f32.mrb[24].mxu0 }
 0x1d8   : > { %v592_v34 = vadd.f32 %v591_v33, %v2277_v21  ;;  %v2359_v35 = vpop.f32.mrb[25].mxu0  ;;  %658 = vadd.xlane.f32.xlu1 %v631_v31 }
 0x1d9   : > { %1566 = vmatprep.subr.bf16.mxu1 %v1565_v32 }
 0x1da   : > { %1568 = vmatpush3.bf16.msra.mxu1 %v1565_v32  ;;  %v632_v36 = vmul.f32 %v2283_v25, %v592_v34  ;;  %v891_v42 = vsel %vm2863_vm0, 1.0, %v592_v34 }
 0x1db   : > { %v597_v38 = vpop.f32.mrb[26].mxu0 }
 0x1dc   : > { %v598_v39 = vadd.f32 %v597_v38, %v2277_v21  ;;  %v2363_v40 = vpop.f32.mrb[27].mxu0  ;;  %660 = vadd.xlane.f32.xlu0 %v632_v36 }
 0x1de   : > { %v892_v43 = vsel %vm2863_vm0, 1.0, %v598_v39  ;;  %v633_v44 = vmul.f32 %v2283_v25, %v598_v39 }
 0x1df   : > { %v1569_v45 = vpack.c.bf16 %v892_v43, %v891_v42  ;;  %v603_v46 = vpop.f32.mrb[28].mxu0 }
 0x1e0   : > { %v604_v47 = vadd.f32 %v603_v46, %v2277_v21  ;;  %v2371_v49 = vpop.f32.mrb[29].mxu0  ;;  %662 = vadd.xlane.f32.xlu1 %v633_v44 }
 0x1e1   : > { %1570 = vmatprep.subr.bf16.mxu1 %v1569_v45 }
 0x1e2   : > { %1572 = vmatpush3.bf16.msra.mxu1 %v1569_v45  ;;  %v634_v50 = vmul.f32 %v2283_v25, %v604_v47  ;;  %v893_v55 = vsel %vm2863_vm0, 1.0, %v604_v47 }
 0x1e3   : > { %v609_v51 = vpop.f32.mrb[30].mxu0 }
 0x1e4   : > { %v610_v53 = vadd.f32 %v609_v51, %v2277_v21  ;;  %v2375_v54 = vpop.f32.mrb[31].mxu0  ;;  %664 = vadd.xlane.f32.xlu0 %v634_v50 }
 0x1e6   : > { %v894_v56 = vsel %vm2863_vm0, 1.0, %v610_v53  ;;  %v635_v57 = vmul.f32 %v2283_v25, %v610_v53 }
 0x1e7   : > { %v1573_v58 = vpack.c.bf16 %v894_v56, %v893_v55 }
 0x1e8   : > { %666 = vadd.xlane.f32.xlu1 %v635_v57 }
 0x1e9   : > { %1574 = vmatprep.subr.bf16.mxu1 %v1573_v58 }
 0x1ea   : > { %1576 = vmatpush3.bf16.msra.mxu1 %v1573_v58 }
 0x239   : > { %v637_v60 = vpop.xlane.xlu0 %636 }
 0x23a   : > { %v684_v61 = vmul.f32 0.2, %v637_v60  ;;  %vm668_vm1 = vcmp.ge.f32.partialorder %v637_v60, 0.0 }
 0x23c   : > { %v700_v62 = vsel %vm668_vm1, %v637_v60, %v684_v61 }
 0x23d   : > { %716 = vxpose.xlu0.b32.start [1/16] %v700_v62, 128  ;;  %v639_v21 = vpop.xlane.xlu0 %638 }
 0x23e   : > { %vm669_vm2 = vcmp.ge.f32.partialorder %v639_v21, 0.0  ;;  %v685_v0 = vmul.f32 0.2, %v639_v21 }
 0x240   : > { %v701_v1 = vsel %vm669_vm2, %v639_v21, %v685_v0  ;;  %v2382_v21 = vld [vmem:[#allocation5] sm:$0xff]  ;;  %v2385_v0 = vld [vmem:[#allocation5 + $0x8] sm:$0xff] }
 0x241   : > { %v641_v2 = vpop.xlane.xlu1 %640  ;;  %717 = vxpose.xlu0.b32.cont [2/16] %v701_v1, 128  ;;  %vm392_vm2 = vcmp.gt.f32.partialorder %v2382_v21, 0.0 }
 0x242   : > { %vm670_vm3 = vcmp.ge.f32.partialorder %v641_v2, 0.0  ;;  %v686_v3 = vmul.f32 0.2, %v641_v2 }
 0x244   : > { %v702_v4 = vsel %vm670_vm3, %v641_v2, %v686_v3  ;;  %vm393_vm3 = vcmp.gt.f32.partialorder %v2385_v0, 0.0  ;;  %v2393_v3 = vld [vmem:[#allocation5 + $0x10] sm:$0xff] }
 0x245   : > { %v643_v5 = vpop.xlane.xlu1 %642  ;;  %718 = vxpose.xlu0.b32.cont [3/16] %v702_v4, 128 }
 0x246   : > { %vm671_vm4 = vcmp.ge.f32.partialorder %v643_v5, 0.0  ;;  %v687_v25 = vmul.f32 0.2, %v643_v5 }
 0x248   : > { %v703_v7 = vsel %vm671_vm4, %v643_v5, %v687_v25  ;;  %vm394_vm4 = vcmp.gt.f32.partialorder %v2393_v3, 0.0  ;;  %v2401_v25 = vld [vmem:[#allocation5 + $0x18] sm:$0xff] }
 0x249   : > { %719 = vxpose.xlu0.b32.cont [4/16] %v703_v7, 128  ;;  %v645_v8 = vpop.xlane.xlu0 %644 }
 0x24a   : > { %vm672_vm5 = vcmp.ge.f32.partialorder %v645_v8, 0.0  ;;  %v688_v9 = vmul.f32 0.2, %v645_v8 }
 0x24c   : > { %v704_v11 = vsel %vm672_vm5, %v645_v8, %v688_v9  ;;  %vm395_vm5 = vcmp.gt.f32.partialorder %v2401_v25, 0.0  ;;  %v2409_v9 = vld [vmem:[#allocation5 + $0x20] sm:$0xff] }
 0x24d   : > { %v647_v12 = vpop.xlane.xlu1 %646  ;;  %720 = vxpose.xlu0.b32.cont [5/16] %v704_v11, 128 }
 0x24e   : > { %vm673_vm6 = vcmp.ge.f32.partialorder %v647_v12, 0.0  ;;  %v689_v13 = vmul.f32 0.2, %v647_v12 }
 0x250   : > { %v705_v14 = vsel %vm673_vm6, %v647_v12, %v689_v13  ;;  %vm396_vm6 = vcmp.gt.f32.partialorder %v2409_v9, 0.0  ;;  %v2417_v13 = vld [vmem:[#allocation5 + $0x28] sm:$0xff] }
 0x251   : > { %721 = vxpose.xlu0.b32.cont [6/16] %v705_v14, 128  ;;  %v649_v15 = vpop.xlane.xlu0 %648 }
 0x252   : > { %vm674_vm7 = vcmp.ge.f32.partialorder %v649_v15, 0.0  ;;  %v690_v16 = vmul.f32 0.2, %v649_v15 }
 0x254   : > { %v706_v19 = vsel %vm674_vm7, %v649_v15, %v690_v16  ;;  %vm397_vm7 = vcmp.gt.f32.partialorder %v2417_v13, 0.0  ;;  %v2425_v16 = vld [vmem:[#allocation5 + $0x30] sm:$0xff] }
 0x255   : > { %v651_v22 = vpop.xlane.xlu1 %650  ;;  %722 = vxpose.xlu0.b32.cont [7/16] %v706_v19, 128 }
 0x256   : > { %vm675_vm8 = vcmp.ge.f32.partialorder %v651_v22, 0.0  ;;  %v691_v23 = vmul.f32 0.2, %v651_v22 }
 0x258   : > { %v707_v28 = vsel %vm675_vm8, %v651_v22, %v691_v23  ;;  %vm398_vm8 = vcmp.gt.f32.partialorder %v2425_v16, 0.0  ;;  %v2433_v23 = vld [vmem:[#allocation5 + $0x38] sm:$0xff] }
 0x259   : > { %723 = vxpose.xlu0.b32.cont [8/16] %v707_v28, 128  ;;  %v653_v29 = vpop.xlane.xlu0 %652 }
 0x25a   : > { %vm676_vm9 = vcmp.ge.f32.partialorder %v653_v29, 0.0  ;;  %v692_v31 = vmul.f32 0.2, %v653_v29 }
 0x25c   : > { %v708_v32 = vsel %vm676_vm9, %v653_v29, %v692_v31  ;;  %vm399_vm9 = vcmp.gt.f32.partialorder %v2433_v23, 0.0  ;;  %v2441_v31 = vld [vmem:[#allocation5 + $0x40] sm:$0xff] }
 0x25d   : > { %v655_v33 = vpop.xlane.xlu1 %654  ;;  %724 = vxpose.xlu0.b32.cont [9/16] %v708_v32, 128 }
 0x25e   : > { %vm677_vm10 = vcmp.ge.f32.partialorder %v655_v33, 0.0  ;;  %v693_v34 = vmul.f32 0.2, %v655_v33 }
 0x260   : > { %v709_v36 = vsel %vm677_vm10, %v655_v33, %v693_v34  ;;  %vm400_vm10 = vcmp.gt.f32.partialorder %v2441_v31, 0.0  ;;  %v2449_v34 = vld [vmem:[#allocation5 + $0x48] sm:$0xff] }
 0x261   : > { %725 = vxpose.xlu0.b32.cont [10/16] %v709_v36, 128  ;;  %v657_v38 = vpop.xlane.xlu0 %656 }
 0x262   : > { %vm678_vm11 = vcmp.ge.f32.partialorder %v657_v38, 0.0  ;;  %v694_v39 = vmul.f32 0.2, %v657_v38 }
 0x264   : > { %v710_v42 = vsel %vm678_vm11, %v657_v38, %v694_v39  ;;  %vm401_vm11 = vcmp.gt.f32.partialorder %v2449_v34, 0.0  ;;  %v2457_v39 = vld [vmem:[#allocation5 + $0x50] sm:$0xff] }
 0x265   : > { %v659_v43 = vpop.xlane.xlu1 %658  ;;  %726 = vxpose.xlu0.b32.cont [11/16] %v710_v42, 128 }
 0x266   : > { %vm679_vm12 = vcmp.ge.f32.partialorder %v659_v43, 0.0  ;;  %v695_v44 = vmul.f32 0.2, %v659_v43 }
 0x268   : > { %v711_v45 = vsel %vm679_vm12, %v659_v43, %v695_v44  ;;  %vm402_vm12 = vcmp.gt.f32.partialorder %v2457_v39, 0.0  ;;  %v2465_v44 = vld [vmem:[#allocation5 + $0x58] sm:$0xff] }
 0x269   : > { %727 = vxpose.xlu0.b32.cont [12/16] %v711_v45, 128  ;;  %v661_v46 = vpop.xlane.xlu0 %660 }
 0x26a   : > { %vm680_vm13 = vcmp.ge.f32.partialorder %v661_v46, 0.0  ;;  %v696_v47 = vmul.f32 0.2, %v661_v46 }
 0x26c   : > { %v712_v50 = vsel %vm680_vm13, %v661_v46, %v696_v47  ;;  %vm403_vm13 = vcmp.gt.f32.partialorder %v2465_v44, 0.0  ;;  %v2473_v47 = vld [vmem:[#allocation5 + $0x60] sm:$0xff] }
 0x26d   : > { %v663_v51 = vpop.xlane.xlu1 %662  ;;  %728 = vxpose.xlu0.b32.cont [13/16] %v712_v50, 128 }
 0x26e   : > { %vm681_vm14 = vcmp.ge.f32.partialorder %v663_v51, 0.0  ;;  %v697_v53 = vmul.f32 0.2, %v663_v51 }
 0x270   : > { %v713_v55 = vsel %vm681_vm14, %v663_v51, %v697_v53  ;;  %vm404_vm14 = vcmp.gt.f32.partialorder %v2473_v47, 0.0  ;;  %v2481_v53 = vld [vmem:[#allocation5 + $0x68] sm:$0xff] }
 0x271   : > { %729 = vxpose.xlu0.b32.cont [14/16] %v713_v55, 128  ;;  %v665_v56 = vpop.xlane.xlu0 %664 }
 0x272   : > { %vm682_vm15 = vcmp.ge.f32.partialorder %v665_v56, 0.0  ;;  %v698_v57 = vmul.f32 0.2, %v665_v56 }
 0x274   : > { %v714_v58 = vsel %vm682_vm15, %v665_v56, %v698_v57  ;;  %vm405_vm15 = vcmp.gt.f32.partialorder %v2481_v53, 0.0  ;;  %v2489_v57 = vld [vmem:[#allocation5 + $0x70] sm:$0xff] }
 0x275   : > { %v667_v60 = vpop.xlane.xlu1 %666  ;;  %730 = vxpose.xlu0.b32.cont [15/16] %v714_v58, 128 }
 0x276   : > { %vm683_vm1 = vcmp.ge.f32.partialorder %v667_v60, 0.0  ;;  %v699_v61 = vmul.f32 0.2, %v667_v60 }
 0x278   : > { %v715_v62 = vsel %vm683_vm1, %v667_v60, %v699_v61  ;;  %vm406_vm1 = vcmp.gt.f32.partialorder %v2489_v57, 0.0  ;;  %v2497_v61 = vld [vmem:[#allocation5 + $0x78] sm:$0xff] }
 0x279   : > { %731 = vxpose.xlu0.b32.end [16/16] %v715_v62, 128  ;;  %vm407_vm0 = vcmp.gt.f32.partialorder %v2497_v61, 0.0 }
 0x2bd   : > { %v2387_v1 = vpop.trf.xlu0 }
 0x2be   : > { %v748_v2 = vsel %vm392_vm2, %v2387_v1, -1e+30 }
 0x2bf   : > { %764 = vmax.xlane.f32.xlu1 %v748_v2 }
 0x2c1   : > { %v2395_v4 = vpop.trf.xlu0 }
 0x2c2   : > { %v749_v5 = vsel %vm393_vm3, %v2395_v4, -1e+30 }
 0x2c3   : > { %766 = vmax.xlane.f32.xlu1 %v749_v5 }
 0x2c5   : > { %v2403_v7 = vpop.trf.xlu0 }
 0x2c6   : > { %v750_v8 = vsel %vm394_vm4, %v2403_v7, -1e+30 }
 0x2c7   : > { %768 = vmax.xlane.f32.xlu1 %v750_v8 }
 0x2c9   : > { %v2411_v11 = vpop.trf.xlu0 }
 0x2ca   : > { %v751_v12 = vsel %vm395_vm5, %v2411_v11, -1e+30 }
 0x2cb   : > { %770 = vmax.xlane.f32.xlu1 %v751_v12 }
 0x2cd   : > { %v2419_v14 = vpop.trf.xlu0 }
 0x2ce   : > { %v752_v15 = vsel %vm396_vm6, %v2419_v14, -1e+30 }
 0x2cf   : > { %772 = vmax.xlane.f32.xlu1 %v752_v15 }
 0x2d1   : > { %v2427_v19 = vpop.trf.xlu0 }
 0x2d2   : > { %v753_v22 = vsel %vm397_vm7, %v2427_v19, -1e+30 }
 0x2d3   : > { %774 = vmax.xlane.f32.xlu1 %v753_v22 }
 0x2d5   : > { %v2435_v28 = vpop.trf.xlu0 }
 0x2d6   : > { %v754_v29 = vsel %vm398_vm8, %v2435_v28, -1e+30 }
 0x2d7   : > { %776 = vmax.xlane.f32.xlu1 %v754_v29 }
 0x2d9   : > { %v2443_v32 = vpop.trf.xlu0 }
 0x2da   : > { %v755_v33 = vsel %vm399_vm9, %v2443_v32, -1e+30 }
 0x2db   : > { %778 = vmax.xlane.f32.xlu1 %v755_v33 }
 0x2dd   : > { %v2451_v36 = vpop.trf.xlu0 }
 0x2de   : > { %v756_v38 = vsel %vm400_vm10, %v2451_v36, -1e+30 }
 0x2df   : > { %780 = vmax.xlane.f32.xlu1 %v756_v38 }
 0x2e1   : > { %v2459_v42 = vpop.trf.xlu0 }
 0x2e2   : > { %v757_v43 = vsel %vm401_vm11, %v2459_v42, -1e+30 }
 0x2e3   : > { %782 = vmax.xlane.f32.xlu1 %v757_v43 }
 0x2e5   : > { %v2467_v45 = vpop.trf.xlu0 }
 0x2e6   : > { %v758_v46 = vsel %vm402_vm12, %v2467_v45, -1e+30 }
 0x2e7   : > { %784 = vmax.xlane.f32.xlu1 %v758_v46 }
 0x2e9   : > { %v2475_v50 = vpop.trf.xlu0 }
 0x2ea   : > { %v759_v51 = vsel %vm403_vm13, %v2475_v50, -1e+30 }
 0x2eb   : > { %786 = vmax.xlane.f32.xlu1 %v759_v51 }
 0x2ed   : > { %v2483_v55 = vpop.trf.xlu0 }
 0x2ee   : > { %v760_v56 = vsel %vm404_vm14, %v2483_v55, -1e+30 }
 0x2ef   : > { %788 = vmax.xlane.f32.xlu1 %v760_v56 }
 0x2f1   : > { %v2491_v58 = vpop.trf.xlu0 }
 0x2f2   : > { %v761_v60 = vsel %vm405_vm15, %v2491_v58, -1e+30 }
 0x2f3   : > { %790 = vmax.xlane.f32.xlu1 %v761_v60 }
 0x2f5   : > { %v2499_v62 = vpop.trf.xlu0 }
 0x2f6   : > { %v762_v2 = vsel %vm406_vm1, %v2499_v62, -1e+30 }
 0x2f7   : > { %792 = vmax.xlane.f32.xlu1 %v762_v2 }
 0x2f9   : > { %v2505_v5 = vpop.trf.xlu0 }
 0x2fa   : > { %v763_v8 = vsel %vm407_vm0, %v2505_v5, -1e+30 }
 0x2fb   : > { %794 = vmax.xlane.f32.xlu1 %v763_v8 }
 0x34c   : > { %v765_v12 = vpop.xlane.xlu1 %764 }
 0x34d   : > { %v796_v15 = vsub.f32 %v2387_v1, %v765_v12 }
 0x34f   : > { %v812_v22 = vsel %vm392_vm2, %v796_v15, -1e+30 }
 0x350   : > { %v828_v29 = vmul.f32 1.442695, %v812_v22  ;;  %v767_v33 = vpop.xlane.xlu1 %766 }
 0x351   : > { %v797_v38 = vsub.f32 %v2395_v4, %v767_v33 }
 0x352   : > { %1661 = vpow2.f32 %v828_v29 }
 0x353   : > { %v813_v43 = vsel %vm393_vm3, %v797_v38, -1e+30 }
 0x354   : > { %v830_v46 = vmul.f32 1.442695, %v813_v43  ;;  %v769_v51 = vpop.xlane.xlu1 %768 }
 0x355   : > { %v798_v56 = vsub.f32 %v2403_v7, %v769_v51 }
 0x356   : > { %1663 = vpow2.f32 %v830_v46 }
 0x357   : > { %v814_v60 = vsel %vm394_vm4, %v798_v56, -1e+30 }
 0x358   : > { %v832_v1 = vmul.f32 1.442695, %v814_v60  ;;  %v771_v2 = vpop.xlane.xlu1 %770 }
 0x359   : > { %v799_v8 = vsub.f32 %v2411_v11, %v771_v2 }
 0x35a   : > { %1665 = vpow2.f32 %v832_v1 }
 0x35b   : > { %v815_v4 = vsel %vm395_vm5, %v799_v8, -1e+30 }
 0x35c   : > { %v1662_v12 = vpop.eup %1661  ;;  %v834_v15 = vmul.f32 1.442695, %v815_v4  ;;  %v773_v22 = vpop.xlane.xlu1 %772 }
 0x35d   : > { %v800_v29 = vsub.f32 %v2419_v14, %v773_v22  ;;  %v860_v33 = vmul.f32 %v1662_v12, %v2382_v21 }
 0x35e   : > { %1667 = vpow2.f32 %v834_v15 }
 0x35f   : > { %v816_v7 = vsel %vm396_vm6, %v800_v29, -1e+30  ;;  %1489 = vmatprep.mubr.f32.mxu1 %v860_v33 }
 0x360   : > { %v1664_v38 = vpop.eup %1663  ;;  %v836_v43 = vmul.f32 1.442695, %v816_v7  ;;  %v775_v46 = vpop.xlane.xlu1 %774 }
 0x361   : > { %v801_v11 = vsub.f32 %v2427_v19, %v775_v46  ;;  %v861_v51 = vmul.f32 %v1664_v38, %v2385_v0 }
 0x362   : > { %1669 = vpow2.f32 %v836_v43 }
 0x363   : > { %v817_v56 = vsel %vm397_vm7, %v801_v11, -1e+30  ;;  %1490 = vmatmul.mubr.f32.vlgmr.msra.gmra.mrb[0].mxu1 %v861_v51 }
 0x364   : > { %v1666_v14 = vpop.eup %1665  ;;  %v838_v60 = vmul.f32 1.442695, %v817_v56  ;;  %v777_v21 = vpop.xlane.xlu1 %776 }
 0x365   : > { %v802_v1 = vsub.f32 %v2435_v28, %v777_v21  ;;  %v862_v2 = vmul.f32 %v1666_v14, %v2393_v3 }
 0x366   : > { %1671 = vpow2.f32 %v838_v60 }
 0x367   : > { %v818_v8 = vsel %vm398_vm8, %v802_v1, -1e+30  ;;  %1492 = vmatprep.mubr.f32.mxu1 %v862_v2 }
 0x368   : > { %v1668_v19 = vpop.eup %1667  ;;  %v840_v4 = vmul.f32 1.442695, %v818_v8  ;;  %v779_v0 = vpop.xlane.xlu1 %778 }
 0x369   : > { %v803_v12 = vsub.f32 %v2443_v32, %v779_v0  ;;  %v863_v15 = vmul.f32 %v1668_v19, %v2401_v25 }
 0x36a   : > { %1673 = vpow2.f32 %v840_v4 }
 0x36b   : > { %v819_v22 = vsel %vm399_vm9, %v803_v12, -1e+30  ;;  %1493 = vmatmul.mubr.f32.gmra.mrb[2].mxu1 %v863_v15 }
 0x36c   : > { %v1670_v28 = vpop.eup %1669  ;;  %v842_v29 = vmul.f32 1.442695, %v819_v22  ;;  %v781_v3 = vpop.xlane.xlu1 %780 }
 0x36d   : > { %v804_v33 = vsub.f32 %v2451_v36, %v781_v3  ;;  %v864_v7 = vmul.f32 %v1670_v28, %v2409_v9 }
 0x36e   : > { %1675 = vpow2.f32 %v842_v29 }
 0x36f   : > { %v820_v38 = vsel %vm400_vm10, %v804_v33, -1e+30  ;;  %1495 = vmatprep.mubr.f32.mxu1 %v864_v7 }
 0x370   : > { %v1672_v32 = vpop.eup %1671  ;;  %v844_v43 = vmul.f32 1.442695, %v820_v38  ;;  %v783_v25 = vpop.xlane.xlu1 %782 }
 0x371   : > { %v805_v46 = vsub.f32 %v2459_v42, %v783_v25  ;;  %v865_v11 = vmul.f32 %v1672_v32, %v2417_v13 }
 0x372   : > { %1677 = vpow2.f32 %v844_v43 }
 0x373   : > { %v821_v51 = vsel %vm401_vm11, %v805_v46, -1e+30  ;;  %1496 = vmatmul.mubr.f32.gmra.mrb[4].mxu1 %v865_v11 }
 0x374   : > { %v1674_v36 = vpop.eup %1673  ;;  %v846_v56 = vmul.f32 1.442695, %v821_v51  ;;  %v785_v9 = vpop.xlane.xlu1 %784 }
 0x375   : > { %v806_v14 = vsub.f32 %v2467_v45, %v785_v9  ;;  %v866_v60 = vmul.f32 %v1674_v36, %v2425_v16 }
 0x376   : > { %1679 = vpow2.f32 %v846_v56 }
 0x377   : > { %v822_v21 = vsel %vm402_vm12, %v806_v14, -1e+30  ;;  %1498 = vmatprep.mubr.f32.mxu1 %v866_v60 }
 0x378   : > { %v1676_v42 = vpop.eup %1675  ;;  %v848_v1 = vmul.f32 1.442695, %v822_v21  ;;  %v787_v13 = vpop.xlane.xlu1 %786 }
 0x379   : > { %v807_v2 = vsub.f32 %v2475_v50, %v787_v13  ;;  %v867_v8 = vmul.f32 %v1676_v42, %v2433_v23 }
 0x37a   : > { %1681 = vpow2.f32 %v848_v1 }
 0x37b   : > { %v823_v19 = vsel %vm403_vm13, %v807_v2, -1e+30  ;;  %1499 = vmatmul.mubr.f32.gmra.mrb[6].mxu1 %v867_v8 }
 0x37c   : > { %v1678_v45 = vpop.eup %1677  ;;  %v850_v4 = vmul.f32 1.442695, %v823_v19  ;;  %v789_v16 = vpop.xlane.xlu1 %788 }
 0x37d   : > { %v808_v0 = vsub.f32 %v2483_v55, %v789_v16  ;;  %v868_v12 = vmul.f32 %v1678_v45, %v2441_v31 }
 0x37e   : > { %1683 = vpow2.f32 %v850_v4 }
 0x37f   : > { %v824_v15 = vsel %vm404_vm14, %v808_v0, -1e+30  ;;  %1501 = vmatprep.mubr.f32.mxu1 %v868_v12 }
 0x380   : > { %v1680_v50 = vpop.eup %1679  ;;  %v852_v22 = vmul.f32 1.442695, %v824_v15  ;;  %v791_v23 = vpop.xlane.xlu1 %790 }
 0x381   : > { %v809_v28 = vsub.f32 %v2491_v58, %v791_v23  ;;  %v869_v29 = vmul.f32 %v1680_v50, %v2449_v34 }
 0x382   : > { %1685 = vpow2.f32 %v852_v22 }
 0x383   : > { %v825_v3 = vsel %vm405_vm15, %v809_v28, -1e+30  ;;  %1502 = vmatmul.mubr.f32.gmra.mrb[8].mxu1 %v869_v29 }
 0x384   : > { %v1682_v55 = vpop.eup %1681  ;;  %v854_v33 = vmul.f32 1.442695, %v825_v3  ;;  %v793_v31 = vpop.xlane.xlu1 %792 }
 0x385   : > { %v810_v7 = vsub.f32 %v2499_v62, %v793_v31  ;;  %v870_v38 = vmul.f32 %v1682_v55, %v2457_v39 }
 0x386   : > { %1687 = vpow2.f32 %v854_v33 }
 0x387   : > { %v826_v32 = vsel %vm406_vm1, %v810_v7, -1e+30  ;;  %1504 = vmatprep.mubr.f32.mxu1 %v870_v38 }
 0x388   : > { %v1684_v58 = vpop.eup %1683  ;;  %v856_v43 = vmul.f32 1.442695, %v826_v32  ;;  %v795_v34 = vpop.xlane.xlu1 %794 }
 0x389   : > { %v811_v25 = vsub.f32 %v2505_v5, %v795_v34  ;;  %v871_v46 = vmul.f32 %v1684_v58, %v2465_v44 }
 0x38a   : > { %1689 = vpow2.f32 %v856_v43 }
 0x38b   : > { %v827_v11 = vsel %vm407_vm0, %v811_v25, -1e+30  ;;  %1505 = vmatmul.mubr.f32.gmra.mrb[10].mxu1 %v871_v46  ;;  %vm2888_vm0 = vcmp.eq.s32.totalorder %v2279_v24, 127 }
 0x38c   : > { %v1686_v62 = vpop.eup %1685  ;;  %v858_v51 = vmul.f32 1.442695, %v827_v11  ;;  %vm2889_vm2 = vmmov %vm2888_vm0 }
 0x38d   : > { %v872_v39 = vmul.f32 %v1686_v62, %v2473_v47  ;;  %vm2890_vm3 = vmmov %vm2888_vm0 }
 0x38e   : > { %1691 = vpow2.f32 %v858_v51  ;;  %vm2891_vm4 = vmmov %vm2888_vm0  ;;  %v449_v51 = vsub.s32 1, %v2270_v18 }
 0x38f   : > { %1507 = vmatprep.mubr.f32.mxu1 %v872_v39  ;;  %vm2892_vm5 = vmmov %vm2888_vm0 }
 0x390   : > { %v1688_v36 = vpop.eup %1687  ;;  %vm2893_vm6 = vmmov %vm2888_vm0 }
 0x391   : > { %v873_v56 = vmul.f32 %v1688_v36, %v2481_v53  ;;  %vm2894_vm7 = vmmov %vm2888_vm0 }
 0x392   : > { %vm2895_vm8 = vmmov %vm2888_vm0 }
 0x393   : > { %1508 = vmatmul.mubr.f32.gmra.mrb[12].mxu1 %v873_v56  ;;  %vm2896_vm9 = vmmov %vm2888_vm0 }
 0x394   : > { %v1690_v9 = vpop.eup %1689  ;;  %vm2897_vm10 = vmmov %vm2888_vm0 }
 0x395   : > { %v874_v5 = vmul.f32 %v1690_v9, %v2489_v57  ;;  %vm2898_vm11 = vmmov %vm2888_vm0  ;;  %v2663_v9 = vrot.slane %v2274_v20, %v449_v51 }
 0x396   : > { %vm2899_vm12 = vmmov %vm2888_vm0 }
 0x397   : > { %1510 = vmatprep.mubr.f32.mxu1 %v874_v5  ;;  %vm2900_vm13 = vmmov %vm2888_vm0  ;;  %v528_v18 = vadd.f32 %v2291_v30, %v2663_v9  ;;  %v522_v30 = vadd.f32 %v2286_v26, %v2663_v9  ;;  %v540_v26 = vadd.f32 %v2303_v41, %v2663_v9  ;;  %v534_v41 = vadd.f32 %v2299_v37, %v2663_v9 }
 0x398   : > { %v1692_v44 = vpop.eup %1691  ;;  %vm2901_vm14 = vmmov %vm2888_vm0  ;;  %v552_v37 = vadd.f32 %v2315_v52, %v2663_v9  ;;  %v546_v52 = vadd.f32 %v2311_v48, %v2663_v9  ;;  %v564_v48 = vadd.f32 %v2327_v63, %v2663_v9 }
 0x399   : > { %v875_v14 = vmul.f32 %v1692_v44, %v2497_v61  ;;  %vm2902_vm15 = vmmov %vm2888_vm0 }
 0x39a   : > { %vm2903_vm1 = vmmov %vm2888_vm0 }
 0x39b   : > { %1511 = vmatmul.mubr.f32.gmra.mrb[14].mxu1 %v875_v14  ;;  %v1251_v14 = vstv %s1250_s28 }
 0x436   : > { %v2574_v60 = vpop.f32.mrb[0].mxu1 }
 0x437   : > { %v2576_v21 = vpop.f32.mrb[1].mxu1  ;;  %v1041_v47 = vsel %vm2888_vm0, %v2574_v60, 0.0 }
 0x438   : > { %1058 = vadd.xlane.f32.xlu1 %v1041_v47  ;;  %v1040_v53 = vsel %vm2889_vm2, %v2576_v21, 0.0 }
 0x43c   : > { %1056 = vadd.xlane.f32.xlu1 %v1040_v53 }
 0x43e   : > { %v2584_v57 = vpop.f32.mrb[2].mxu1 }
 0x43f   : > { %v2586_v42 = vpop.f32.mrb[3].mxu1  ;;  %v1043_v61 = vsel %vm2890_vm3, %v2584_v57, 0.0 }
 0x440   : > { %1062 = vadd.xlane.f32.xlu1 %v1043_v61  ;;  %v1042_v1 = vsel %vm2891_vm4, %v2586_v42, 0.0  ;;  %vm1136_vm4 = vcmp.ne.s32.totalorder %v2279_v24, 127 }
 0x444   : > { %1060 = vadd.xlane.f32.xlu1 %v1042_v1 }
 0x446   : > { %v2594_v13 = vpop.f32.mrb[4].mxu1 }
 0x447   : > { %v2596_v2 = vpop.f32.mrb[5].mxu1  ;;  %v1045_v8 = vsel %vm2892_vm5, %v2594_v13, 0.0 }
 0x448   : > { %1066 = vadd.xlane.f32.xlu1 %v1045_v8  ;;  %v1044_v19 = vsel %vm2893_vm6, %v2596_v2, 0.0 }
 0x44c   : > { %1064 = vadd.xlane.f32.xlu1 %v1044_v19 }
 0x44e   : > { %v2604_v45 = vpop.f32.mrb[6].mxu1 }
 0x44f   : > { %v2606_v4 = vpop.f32.mrb[7].mxu1  ;;  %v1047_v16 = vsel %vm2894_vm7, %v2604_v45, 0.0 }
 0x450   : > { %1070 = vadd.xlane.f32.xlu1 %v1047_v16  ;;  %v1046_v0 = vsel %vm2895_vm8, %v2606_v4, 0.0  ;;  %vm2672_vm8 = vcmp.eq.s32.totalorder %v1251_v14, 1 }
 0x454   : > { %1068 = vadd.xlane.f32.xlu1 %v1046_v0 }
 0x456   : > { %v2614_v12 = vpop.f32.mrb[8].mxu1 }
 0x457   : > { %v2616_v15 = vpop.f32.mrb[9].mxu1  ;;  %v1049_v50 = vsel %vm2896_vm9, %v2614_v12, 0.0 }
 0x458   : > { %1074 = vadd.xlane.f32.xlu1 %v1049_v50  ;;  %v1048_v22 = vsel %vm2897_vm10, %v2616_v15, 0.0 }
 0x45c   : > { %1072 = vadd.xlane.f32.xlu1 %v1048_v22 }
 0x45e   : > { %v2624_v23 = vpop.f32.mrb[10].mxu1 }
 0x45f   : > { %v2626_v28 = vpop.f32.mrb[11].mxu1  ;;  %v1051_v29 = vsel %vm2898_vm11, %v2624_v23, 0.0 }
 0x460   : > { %1078 = vadd.xlane.f32.xlu0 %v1051_v29  ;;  %v1050_v3 = vsel %vm2899_vm12, %v2626_v28, 0.0 }
 0x461   : > { %1076 = vadd.xlane.f32.xlu1 %v1050_v3 }
 0x466   : > { %v2634_v55 = vpop.f32.mrb[12].mxu1 }
 0x467   : > { %v2636_v33 = vpop.f32.mrb[13].mxu1  ;;  %v1053_v31 = vsel %vm2900_vm13, %v2634_v55, 0.0 }
 0x468   : > { %1082 = vadd.xlane.f32.xlu1 %v1053_v31  ;;  %v1052_v7 = vsel %vm2901_vm14, %v2636_v33, 0.0 }
 0x46c   : > { %1080 = vadd.xlane.f32.xlu1 %v1052_v7 }
 0x46e   : > { %v2644_v38 = vpop.f32.mrb[14].mxu1 }
 0x46f   : > { %v2646_v32 = vpop.f32.mrb[15].mxu1  ;;  %v1055_v43 = vsel %vm2903_vm1, %v2644_v38, 0.0 }
 0x470   : > { %v1054_v58 = vsel %vm2902_vm15, %v2646_v32, 0.0 }
 0x471   : > { %1084 = vadd.xlane.f32.xlu1 %v1054_v58 }
 0x475   : > { %1086 = vadd.xlane.f32.xlu1 %v1055_v43 }
 0x4c5   : > { %v1059_v34 = vpop.xlane.xlu1 %1058 }
 0x4c6   : > { %vm1089_vm0 = vcmp.gt.f32.partialorder %v1059_v34, 0.0 }
 0x4c7   : > { %v1105_v25 = vsel %vm1089_vm0, %v1059_v34, 1.0  ;;  %vm1170_vm6 = vmand %vm1089_vm0, %vm1136_vm4 }
 0x4c8   : > { %1693 = vrcp.f32 %v1105_v25 }
 0x4c9   : > { %v1057_v46 = vpop.xlane.xlu1 %1056 }
 0x4ca   : > { %vm1088_vm2 = vcmp.gt.f32.partialorder %v1057_v46, 0.0 }
 0x4cb   : > { %v1104_v11 = vsel %vm1088_vm2, %v1057_v46, 1.0  ;;  %vm1169_vm9 = vmand %vm1088_vm2, %vm1136_vm4 }
 0x4cc   : > { %1695 = vrcp.f32 %v1104_v11 }
 0x4cd   : > { %v1063_v62 = vpop.xlane.xlu1 %1062 }
 0x4ce   : > { %vm1091_vm3 = vcmp.gt.f32.partialorder %v1063_v62, 0.0 }
 0x4cf   : > { %v1107_v39 = vsel %vm1091_vm3, %v1063_v62, 1.0  ;;  %vm1172_vm11 = vmand %vm1091_vm3, %vm1136_vm4 }
 0x4d0   : > { %1697 = vrcp.f32 %v1107_v39 }
 0x4d1   : > { %v1061_v36 = vpop.xlane.xlu1 %1060 }
 0x4d2   : > { %v1694_v56 = vpop.eup %1693  ;;  %vm1090_vm5 = vcmp.gt.f32.partialorder %v1061_v36, 0.0 }
 0x4d3   : > { %v1186_v5 = vmul.f32 %v1694_v56, %v2574_v60  ;;  %v1106_v44 = vsel %vm1090_vm5, %v1061_v36, 1.0  ;;  %vm1171_vm13 = vmand %vm1090_vm5, %vm1136_vm4 }
 0x4d4   : > { %1699 = vrcp.f32 %v1106_v44 }
 0x4d5   : > { %v1202_v47 = vsel %vm1170_vm6, %v1186_v5, 0.0  ;;  %v1067_v53 = vpop.xlane.xlu1 %1066 }
 0x4d6   : > { %v1696_v61 = vpop.eup %1695  ;;  %v1218_v1 = vadd.f32 %v1202_v47, %v528_v18  ;;  %vm1093_vm7 = vcmp.gt.f32.partialorder %v1067_v53, 0.0 }
 0x4d7   : > { %v1185_v60 = vmul.f32 %v1696_v61, %v2576_v21  ;;  %v1109_v8 = vsel %vm1093_vm7, %v1067_v53, 1.0  ;;  %vm1174_vm15 = vmand %vm1093_vm7, %vm1136_vm4 }
 0x4d8   : > { %v1235_v19 = vmax.f32 %v1218_v1, 0.0  ;;  %1701 = vrcp.f32 %v1109_v8 }
 0x4d9   : > { %v1201_v16 = vsel %vm1169_vm9, %v1185_v60, 0.0  ;;  %v1065_v0 = vpop.xlane.xlu1 %1064 }
 0x4da   : > { %v1698_v50 = vpop.eup %1697  ;;  %v1254_v22 = vsel %vm2672_vm8, %v1218_v1, %v1235_v19  ;;  %v1217_v29 = vadd.f32 %v1201_v16, %v522_v30  ;;  %vm1092_vm10 = vcmp.gt.f32.partialorder %v1065_v0, 0.0 }
 0x4db   : > { %1270 = vst [vmem:[#allocation10 + $0x8] sm:$0xff] %v1254_v22  ;;  %v1188_v21 = vmul.f32 %v1698_v50, %v2584_v57  ;;  %v1108_v3 = vsel %vm1092_vm10, %v1065_v0, 1.0  ;;  %vm1173_vm0 = vmand %vm1092_vm10, %vm1136_vm4 }
 0x4dc   : > { %v1234_v31 = vmax.f32 %v1217_v29, 0.0  ;;  %1703 = vrcp.f32 %v1108_v3 }
 0x4dd   : > { %v1204_v7 = vsel %vm1172_vm11, %v1188_v21, 0.0  ;;  %v1071_v58 = vpop.xlane.xlu1 %1070 }
 0x4de   : > { %v1700_v43 = vpop.eup %1699  ;;  %v1253_v34 = vsel %vm2672_vm8, %v1217_v29, %v1234_v31  ;;  %v1220_v25 = vadd.f32 %v1204_v7, %v540_v26  ;;  %vm1095_vm12 = vcmp.gt.f32.partialorder %v1071_v58, 0.0 }
 0x4df   : > { %1269 = vst [vmem:[#allocation10] sm:$0xff] %v1253_v34  ;;  %v1187_v57 = vmul.f32 %v1700_v43, %v2586_v42  ;;  %v1111_v46 = vsel %vm1095_vm12, %v1071_v58, 1.0  ;;  %vm1176_vm3 = vmand %vm1095_vm12, %vm1136_vm4  ;;  %v558_v58 = vadd.f32 %v2323_v59, %v2663_v9  ;;  %v576_v59 = vadd.f32 %v2339_v10, %v2663_v9 }
 0x4e0   : > { %v1237_v11 = vmax.f32 %v1220_v25, 0.0  ;;  %1705 = vrcp.f32 %v1111_v46  ;;  %v570_v10 = vadd.f32 %v2335_v6, %v2663_v9 }
 0x4e1   : > { %v1203_v62 = vsel %vm1171_vm13, %v1187_v57, 0.0  ;;  %v1069_v51 = vpop.xlane.xlu1 %1068 }
 0x4e2   : > { %v1702_v39 = vpop.eup %1701  ;;  %v1256_v56 = vsel %vm2672_vm8, %v1220_v25, %v1237_v11  ;;  %v1219_v5 = vadd.f32 %v1203_v62, %v534_v41  ;;  %vm1094_vm14 = vcmp.gt.f32.partialorder %v1069_v51, 0.0 }
 0x4e3   : > { %1272 = vst [vmem:[#allocation10 + $0x18] sm:$0xff] %v1256_v56  ;;  %v1190_v42 = vmul.f32 %v1702_v39, %v2594_v13  ;;  %v1110_v44 = vsel %vm1094_vm14, %v1069_v51, 1.0  ;;  %vm1175_vm7 = vmand %vm1094_vm14, %vm1136_vm4 }
 0x4e4   : > { %v1236_v18 = vmax.f32 %v1219_v5, 0.0  ;;  %1707 = vrcp.f32 %v1110_v44 }
 0x4e5   : > { %v1206_v36 = vsel %vm1174_vm15, %v1190_v42, 0.0  ;;  %v1075_v14 = vpop.xlane.xlu1 %1074 }
 0x4e6   : > { %v1704_v47 = vpop.eup %1703  ;;  %v1255_v61 = vsel %vm2672_vm8, %v1219_v5, %v1236_v18  ;;  %v1222_v1 = vadd.f32 %v1206_v36, %v552_v37  ;;  %vm1097_vm1 = vcmp.gt.f32.partialorder %v1075_v14, 0.0 }
 0x4e7   : > { %1271 = vst [vmem:[#allocation10 + $0x10] sm:$0xff] %v1255_v61  ;;  %v1189_v13 = vmul.f32 %v1704_v47, %v2596_v2  ;;  %v1113_v60 = vsel %vm1097_vm1, %v1075_v14, 1.0  ;;  %vm1178_vm9 = vmand %vm1097_vm1, %vm1136_vm4 }
 0x4e8   : > { %v1239_v8 = vmax.f32 %v1222_v1, 0.0  ;;  %1709 = vrcp.f32 %v1113_v60 }
 0x4e9   : > { %v1205_v53 = vsel %vm1173_vm0, %v1189_v13, 0.0  ;;  %v1073_v30 = vpop.xlane.xlu1 %1072 }
 0x4ea   : > { %v1706_v19 = vpop.eup %1705  ;;  %v1258_v16 = vsel %vm2672_vm8, %v1222_v1, %v1239_v8  ;;  %v1221_v50 = vadd.f32 %v1205_v53, %v546_v52  ;;  %vm1096_vm2 = vcmp.gt.f32.partialorder %v1073_v30, 0.0  ;;  %v588_v1 = vadd.f32 %v2351_v27, %v2663_v9 }
 0x4eb   : > { %1274 = vst [vmem:[#allocation10 + $0x28] sm:$0xff] %v1258_v16  ;;  %v1192_v2 = vmul.f32 %v1706_v19, %v2604_v45  ;;  %v1112_v22 = vsel %vm1096_vm2, %v1073_v30, 1.0  ;;  %vm1177_vm11 = vmand %vm1096_vm2, %vm1136_vm4  ;;  %v582_v52 = vadd.f32 %v2347_v17, %v2663_v9 }
 0x4ec   : > { %v1238_v29 = vmax.f32 %v1221_v50, 0.0  ;;  %1711 = vrcp.f32 %v1112_v22 }
 0x4ed   : > { %v1208_v0 = vsel %vm1176_vm3, %v1192_v2, 0.0  ;;  %v1079_v21 = vpop.xlane.xlu0 %1078 }
 0x4ee   : > { %v1708_v3 = vpop.eup %1707  ;;  %v1257_v26 = vsel %vm2672_vm8, %v1221_v50, %v1238_v29  ;;  %v1224_v31 = vadd.f32 %v1208_v0, %v564_v48  ;;  %vm1099_vm5 = vcmp.gt.f32.partialorder %v1079_v21, 0.0  ;;  %v1077_v45 = vpop.xlane.xlu1 %1076  ;;  %v600_v0 = vadd.f32 %v2363_v40, %v2663_v9 }
 0x4ef   : > { %1273 = vst [vmem:[#allocation10 + $0x20] sm:$0xff] %v1257_v26  ;;  %v1191_v7 = vmul.f32 %v1708_v3, %v2606_v4  ;;  %v1115_v63 = vsel %vm1099_vm5, %v1079_v21, 1.0  ;;  %vm1098_vm6 = vcmp.gt.f32.partialorder %v1077_v45, 0.0  ;;  %vm1180_vm13 = vmand %vm1099_vm5, %vm1136_vm4 }
 0x4f0   : > { %v1241_v43 = vmax.f32 %v1224_v31, 0.0  ;;  %1713 = vrcp.f32 %v1115_v63  ;;  %v1114_v34 = vsel %vm1098_vm6, %v1077_v45, 1.0  ;;  %vm1179_vm14 = vmand %vm1098_vm6, %vm1136_vm4 }
 0x4f1   : > { %v1207_v25 = vsel %vm1175_vm7, %v1191_v7, 0.0  ;;  %1715 = vrcp.f32 %v1114_v34 }
 0x4f2   : > { %v1710_v57 = vpop.eup %1709  ;;  %v1260_v4 = vsel %vm2672_vm8, %v1224_v31, %v1241_v43  ;;  %v1223_v46 = vadd.f32 %v1207_v25, %v558_v58 }
 0x4f3   : > { %1276 = vst [vmem:[#allocation10 + $0x38] sm:$0xff] %v1260_v4  ;;  %v1194_v41 = vmul.f32 %v1710_v57, %v2614_v12 }
 0x4f4   : > { %v1240_v11 = vmax.f32 %v1223_v46, 0.0 }
 0x4f5   : > { %v1210_v62 = vsel %vm1178_vm9, %v1194_v41, 0.0  ;;  %v1083_v51 = vpop.xlane.xlu1 %1082 }
 0x4f6   : > { %v1712_v39 = vpop.eup %1711  ;;  %v1259_v56 = vsel %vm2672_vm8, %v1223_v46, %v1240_v11  ;;  %v1226_v5 = vadd.f32 %v1210_v62, %v576_v59  ;;  %vm1101_vm10 = vcmp.gt.f32.partialorder %v1083_v51, 0.0 }
 0x4f7   : > { %1275 = vst [vmem:[#allocation10 + $0x30] sm:$0xff] %v1259_v56  ;;  %v1193_v42 = vmul.f32 %v1712_v39, %v2616_v15  ;;  %v1117_v12 = vsel %vm1101_vm10, %v1083_v51, 1.0  ;;  %vm1182_vm0 = vmand %vm1101_vm10, %vm1136_vm4 }
 0x4f8   : > { %v1243_v44 = vmax.f32 %v1226_v5, 0.0  ;;  %1717 = vrcp.f32 %v1117_v12 }
 0x4f9   : > { %v1209_v37 = vsel %vm1177_vm11, %v1193_v42, 0.0  ;;  %v1081_v18 = vpop.xlane.xlu1 %1080 }
 0x4fa   : > { %v1714_v36 = vpop.eup %1713  ;;  %v1262_v14 = vsel %vm2672_vm8, %v1226_v5, %v1243_v44  ;;  %v1225_v47 = vadd.f32 %v1209_v37, %v570_v10  ;;  %vm1100_vm12 = vcmp.gt.f32.partialorder %v1081_v18, 0.0 }
 0x4fb   : > { %v1716_v15 = vpop.eup %1715  ;;  %1278 = vst [vmem:[#allocation10 + $0x48] sm:$0xff] %v1262_v14  ;;  %v1196_v61 = vmul.f32 %v1714_v36, %v2624_v23  ;;  %v1116_v6 = vsel %vm1100_vm12, %v1081_v18, 1.0  ;;  %vm1181_vm2 = vmand %vm1100_vm12, %vm1136_vm4 }
 0x4fc   : > { %v1242_v13 = vmax.f32 %v1225_v47, 0.0  ;;  %v1195_v60 = vmul.f32 %v1716_v15, %v2626_v28  ;;  %1719 = vrcp.f32 %v1116_v6 }
 0x4fd   : > { %v1212_v8 = vsel %vm1180_vm13, %v1196_v61, 0.0 }
 0x4fe   : > { %v1261_v23 = vsel %vm2672_vm8, %v1225_v47, %v1242_v13  ;;  %v1228_v27 = vadd.f32 %v1212_v8, %v588_v1  ;;  %v1211_v53 = vsel %vm1179_vm14, %v1195_v60, 0.0  ;;  %v1085_v30 = vpop.xlane.xlu1 %1084 }
 0x4ff   : > { %1277 = vst [vmem:[#allocation10 + $0x40] sm:$0xff] %v1261_v23  ;;  %v1227_v19 = vadd.f32 %v1211_v53, %v582_v52  ;;  %vm1102_vm15 = vcmp.gt.f32.partialorder %v1085_v30, 0.0 }
 0x500   : > { %v1245_v16 = vmax.f32 %v1228_v27, 0.0  ;;  %v1118_v28 = vsel %vm1102_vm15, %v1085_v30, 1.0  ;;  %vm1183_vm3 = vmand %vm1102_vm15, %vm1136_vm4 }
 0x501   : > { %v1244_v50 = vmax.f32 %v1227_v19, 0.0  ;;  %1721 = vrcp.f32 %v1118_v28 }
 0x502   : > { %v1718_v17 = vpop.eup %1717  ;;  %v1264_v2 = vsel %vm2672_vm8, %v1228_v27, %v1245_v16  ;;  %v1087_v22 = vpop.xlane.xlu1 %1086 }
 0x503   : > { %1280 = vst [vmem:[#allocation10 + $0x58] sm:$0xff] %v1264_v2  ;;  %v1263_v48 = vsel %vm2672_vm8, %v1227_v19, %v1244_v50  ;;  %v1198_v29 = vmul.f32 %v1718_v17, %v2634_v55  ;;  %vm1103_vm1 = vcmp.gt.f32.partialorder %v1087_v22, 0.0  ;;  %v594_v55 = vadd.f32 %v2359_v35, %v2663_v9 }
 0x504   : > { %1279 = vst [vmem:[#allocation10 + $0x50] sm:$0xff] %v1263_v48  ;;  %v1119_v21 = vsel %vm1103_vm1, %v1087_v22, 1.0  ;;  %vm1184_vm5 = vmand %vm1103_vm1, %vm1136_vm4 }
 0x505   : > { %v1214_v3 = vsel %vm1182_vm0, %v1198_v29, 0.0  ;;  %1723 = vrcp.f32 %v1119_v21 }
 0x506   : > { %v1720_v26 = vpop.eup %1719  ;;  %v1230_v31 = vadd.f32 %v1214_v3, %v600_v0 }
 0x507   : > { %v1197_v45 = vmul.f32 %v1720_v26, %v2636_v33  ;;  %v606_v33 = vadd.f32 %v2371_v49, %v2663_v9 }
 0x508   : > { %v1247_v7 = vmax.f32 %v1230_v31, 0.0 }
 0x509   : > { %v1213_v40 = vsel %vm1181_vm2, %v1197_v45, 0.0 }
 0x50a   : > { %v1266_v63 = vsel %vm2672_vm8, %v1230_v31, %v1247_v7  ;;  %v1229_v58 = vadd.f32 %v1213_v40, %v594_v55 }
 0x50b   : > { %v1722_v43 = vpop.eup %1721  ;;  %1282 = vst [vmem:[#allocation10 + $0x68] sm:$0xff] %v1266_v63 }
 0x50c   : > { %v1246_v34 = vmax.f32 %v1229_v58, 0.0  ;;  %v1199_v25 = vmul.f32 %v1722_v43, %v2646_v32  ;;  %v612_v32 = vadd.f32 %v2375_v54, %v2663_v9 }
 0x50e   : > { %v1265_v35 = vsel %vm2672_vm8, %v1229_v58, %v1246_v34  ;;  %v1215_v57 = vsel %vm1183_vm3, %v1199_v25, 0.0 }
 0x50f   : > { %v1724_v4 = vpop.eup %1723  ;;  %1281 = vst [vmem:[#allocation10 + $0x60] sm:$0xff] %v1265_v35  ;;  %v1231_v46 = vadd.f32 %v1215_v57, %v606_v33 }
 0x510   : > { %v1200_v41 = vmul.f32 %v1724_v4, %v2644_v38 }
 0x511   : > { %v1248_v59 = vmax.f32 %v1231_v46, 0.0 }
 0x512   : > { %v1216_v49 = vsel %vm1184_vm5, %v1200_v41, 0.0 }
 0x513   : > { %v1267_v11 = vsel %vm2672_vm8, %v1231_v46, %v1248_v59  ;;  %v1232_v62 = vadd.f32 %v1216_v49, %v612_v32 }
 0x514   : > { %1283 = vst [vmem:[#allocation10 + $0x70] sm:$0xff] %v1267_v11 }
 0x515   : > { %v1249_v51 = vmax.f32 %v1232_v62, 0.0 }
 0x517   : > { %v1268_v38 = vsel %vm2672_vm8, %v1232_v62, %v1249_v51 }
 0x518   : > { %1284 = vst [vmem:[#allocation10 + $0x78] sm:$0xff] %v1268_v38 }
 0x519   : > { %1884 = shalt.err (!%p1881_p13)
}
 0x51a   : > { %s1885_s12 = scalar_lea.hbm %s2850_s5, 2048 }
 0x51b   : > { %p1886_p10 = scmp.ne.s32.totalorder %s2850_s5, %s1885_s12  ;;  %p1891_p3 = scmp.lt.u32.totalorder %s1885_s12, %s2850_s5 }
 0x51d   : > { %p1887_p9 = pnand %p1886_p10, %p1233_p6 }
 0x51f   : > { %p1888_p1 = pneg %p1887_p9 }
 0x521   : > { %p1893_p12 = pnand %p1891_p3, %p1888_p1 }
 0x523   : > { %1896 = shalt.err (!%p1893_p12)
}
 0x524   : > { %s1956_s9 = smov 128   ;;  %s1957_s25 = smov 8  }
 0x525   : > { %1592 = dma.vmem_to_hbm [thread:$0]  (%p1233_p6), %s1292_s17, 2048, %s2850_s5, [#allocation4], %s1956_s9, %s1956_s9, %s1957_s25  }
 0x526   : > { %1926 = dma.done.wait (%p1233_p6), [#allocation4], 2048  }
 0x527   : > { %1928 = vsyncadd (%p1233_p6), [#allocation4], 4294965248 }
 0x528 PF: > { %s2906_s29 = sld [smem:[#allocation15_spill]]  ;;  %p15_p2 = scmp.ge.s32.totalorder %s2010_s23, 5  }
 0x529   : > { %s2907_s18 = smov %s1935_s19  ;;  %s2908_s19 = smov %s1939_s20 }
 0x52a   : > { %s2910_s21 = smov %s2010_s23  ;;  %17 = sbr.rel (!%p15_p2) target bundleno = 6 (0x6), region = 110 }
 0x52e   : > { %s2909_s20 = smov %s2906_s29 }
 0x531   :  { %1307 = vsyncpa [#allocation3], 1 }
 0x532   :  { %1309 = vsyncpa [#allocation3 + $0x1], 1 }
 0x533   :  { %1310 = vsyncpa [#allocation6], 1 }
 0x534   :  { %1311 = vsyncpa [#allocation4], 1 }
 0x535   :  { %1313 = vsyncpa [#allocation4 + $0x1], 1 }

</bundles_post_ra>
